<compile_context>
chip_gen: v7x
topology: tpu7x:2x2x1
jax: 0.10.0
libtpu: 0.0.40
codegen_flags: <defaults>
</compile_context>

<pallas_src>
import math
import functools

import jax
import jax.numpy as jnp
from jax.experimental import pallas as pl
from jax.experimental.pallas import tpu as pltpu

MAX_RES = 15.0
MIN_RES = 15.0 / 2000.0
DIV_FACTOR = 4
EPS = 1e-8

LANES = 128
SUBLANES = 8
MAX_TILE_ROWS = 256     # 256x128 f32 input block (~128 KiB), output block ~1.5 MiB


def make_frequencies(max_res=MAX_RES, min_res=MIN_RES, div_factor=DIV_FACTOR):
    n_freq = int(math.log(max_res / min_res, div_factor)) + 1
    return tuple(2.0 * math.pi * float(div_factor) ** k / max_res
                 for k in range(n_freq))


def _sinusoids_kernel(x_ref, o_ref, *, freqs):
    # x_ref: [TR, 128] f32      o_ref: [2*NF, TR, 128] f32
    n_freq = len(freqs)
    xv = jnp.sqrt(x_ref[...] + EPS)                 # [TR, 128]
    for k, f in enumerate(freqs):                   # unrolled (n_freq = 6)
        emb = xv * f                                # scalar * full vreg slab (VPU)
        o_ref[k] = jnp.sin(emb)                     # full-lane (unmasked) stores
        o_ref[n_freq + k] = jnp.cos(emb)


def sinusoids_embedding(x, *, max_res=MAX_RES, min_res=MIN_RES,
                        div_factor=DIV_FACTOR):
    """Pallas TPU forward of SinusoidsEmbeddingNew.

    Accepts x of shape [..., 1] (PyTorch usage) or any shape treated
    element-wise; returns float32 of shape [..., 2 * n_frequencies].
    """
    freqs = make_frequencies(max_res, min_res, div_factor)
    n_freq = len(freqs)
    emb_dim = 2 * n_freq

    shape = x.shape
    lead_shape = shape[:-1] if (len(shape) > 0 and shape[-1] == 1) else shape
    n = 1
    for d in lead_shape:
        n *= int(d)

    x_flat = jnp.reshape(x, (n,)).astype(jnp.float32)

    # Pack the element axis onto (sublane, lane): pad to whole (tile_rows, 128)
    # blocks so every block is (8,128)-aligned and stores are unmasked.
    rows_needed = max(1, -(-n // LANES))
    rows_aligned = -(-rows_needed // SUBLANES) * SUBLANES
    tile_rows = min(MAX_TILE_ROWS, rows_aligned)
    n_rows = -(-rows_aligned // tile_rows) * tile_rows
    n_pad = n_rows * LANES
    x2d = jnp.pad(x_flat, (0, n_pad - n)).reshape(n_rows, LANES)

    grid = (n_rows // tile_rows,)
    kernel = functools.partial(_sinusoids_kernel, freqs=freqs)
    out = pl.pallas_call(
        kernel,
        grid=grid,
        in_specs=[pl.BlockSpec((tile_rows, LANES), lambda i: (i, 0))],
        out_specs=pl.BlockSpec((emb_dim, tile_rows, LANES),
                               lambda i: (0, i, 0)),
        out_shape=jax.ShapeDtypeStruct((emb_dim, n_rows, LANES), jnp.float32),
        compiler_params=pltpu.CompilerParams(
            dimension_semantics=("parallel",)),   # megacore / v7x 2-TC sharding
    )(x2d)

    # [2*NF, R, 128] -> [R, 128, 2*NF] -> [n, 2*NF] -> [..., 2*NF]
    emb = out.transpose(1, 2, 0).reshape(n_pad, emb_dim)[:n]
    return emb.reshape(*lead_shape, emb_dim)


def reference(x, *, max_res=MAX_RES, min_res=MIN_RES, div_factor=DIV_FACTOR):
    """Pure-JAX replica of the PyTorch forward (for correctness checking)."""
    freqs = jnp.asarray(make_frequencies(max_res, min_res, div_factor),
                        jnp.float32)
    xs = jnp.sqrt(x.astype(jnp.float32) + EPS)
    emb = xs * freqs                     # broadcast over trailing dim of size 1
    return jnp.concatenate([jnp.sin(emb), jnp.cos(emb)], axis=-1)


if __name__ == "__main__":
    key = jax.random.PRNGKey(0)
    k1, k2 = jax.random.split(key)

    # 1) batched [..., 1] input, as used in egnn_new.py (squared distances).
    x1 = jax.random.uniform(k1, (2, 640, 1), jnp.float32)
    out1 = sinusoids_embedding(x1)
    jax.block_until_ready(out1)
    ref1 = reference(x1)
    assert out1.shape == (2, 640, 12), out1.shape
    # Tolerance covers possibly different sin/cos polynomial / argument-reduction
    # between Mosaic and XLA lowerings (args up to ~430); any real bug (wrong
    # frequency, sin/cos order, layout unpack) produces O(1) errors.
    assert jnp.allclose(out1, ref1, rtol=3e-4, atol=3e-4)

    # 2) larger flat input: exercises padding + a multi-step "parallel" grid.
    x2 = jax.random.uniform(k2, (40000, 1), jnp.float32)
    out2 = sinusoids_embedding(x2)
    jax.block_until_ready(out2)
    ref2 = reference(x2)
    assert out2.shape == (40000, 12), out2.shape
    assert jnp.allclose(out2, ref2, rtol=3e-4, atol=3e-4)

    print("KERNEL_OK")
</pallas_src>

<mosaic_0001>
module attributes {stable_mosaic.version = 11 : i64} {
  func.func @_sinusoids_kernel(%arg0: i32, %arg1: memref<16x128xf32, #tpu.memory_space<vmem>>, %arg2: memref<12x16x128xf32, #tpu.memory_space<vmem>>) attributes {dimension_semantics = [#tpu.dimension_semantics<parallel>], iteration_bounds = array<i64: 1>, scalar_prefetch = 0 : i64, scratch_operands = 0 : i64, tpu.core_type = #tpu.core_type<tc>, window_params = [{transform_indices = @transform_0, window_bounds = array<i64: 16, 128>}, {transform_indices = @transform_1, window_bounds = array<i64: 12, 16, 128>}]} {
    %c0 = arith.constant 0 : index
    %c0_0 = arith.constant 0 : index
    %0 = vector.load %arg1[%c0, %c0_0] : memref<16x128xf32, #tpu.memory_space<vmem>>, vector<16x128xf32>
    %cst = arith.constant 9.99999993E-9 : f32
    %1 = vector.broadcast %cst : f32 to vector<16x128xf32>
    %2 = arith.addf %0, %1 : vector<16x128xf32>
    %3 = math.sqrt %2 : vector<16x128xf32>
    %cst_1 = arith.constant 0.418879032 : f32
    %4 = vector.broadcast %cst_1 : f32 to vector<16x128xf32>
    %5 = arith.mulf %3, %4 : vector<16x128xf32>
    %6 = math.sin %5 : vector<16x128xf32>
    %c0_2 = arith.constant 0 : index
    %c0_3 = arith.constant 0 : index
    %c0_4 = arith.constant 0 : index
    %7 = vector.load %arg2[%c0_2, %c0_3, %c0_4] : memref<12x16x128xf32, #tpu.memory_space<vmem>>, vector<1x16x128xf32>
    %8 = vector.shape_cast %7 : vector<1x16x128xf32> to vector<16x128xf32>
    %9 = vector.shape_cast %6 : vector<16x128xf32> to vector<1x16x128xf32>
    tpu.vector_store %arg2[%c0_2, %c0_3, %c0_4], %9 {strides = array<i32>} : memref<12x16x128xf32, #tpu.memory_space<vmem>>, vector<1x16x128xf32>,
    %10 = math.cos %5 : vector<16x128xf32>
    %c6 = arith.constant 6 : index
    %c0_5 = arith.constant 0 : index
    %c0_6 = arith.constant 0 : index
    %11 = vector.load %arg2[%c6, %c0_5, %c0_6] : memref<12x16x128xf32, #tpu.memory_space<vmem>>, vector<1x16x128xf32>
    %12 = vector.shape_cast %11 : vector<1x16x128xf32> to vector<16x128xf32>
    %13 = vector.shape_cast %10 : vector<16x128xf32> to vector<1x16x128xf32>
    tpu.vector_store %arg2[%c6, %c0_5, %c0_6], %13 {strides = array<i32>} : memref<12x16x128xf32, #tpu.memory_space<vmem>>, vector<1x16x128xf32>,
    %cst_7 = arith.constant 1.67551613 : f32
    %14 = vector.broadcast %cst_7 : f32 to vector<16x128xf32>
    %15 = arith.mulf %3, %14 : vector<16x128xf32>
    %16 = math.sin %15 : vector<16x128xf32>
    %c1 = arith.constant 1 : index
    %c0_8 = arith.constant 0 : index
    %c0_9 = arith.constant 0 : index
    %17 = vector.load %arg2[%c1, %c0_8, %c0_9] : memref<12x16x128xf32, #tpu.memory_space<vmem>>, vector<1x16x128xf32>
    %18 = vector.shape_cast %17 : vector<1x16x128xf32> to vector<16x128xf32>
    %19 = vector.shape_cast %16 : vector<16x128xf32> to vector<1x16x128xf32>
    tpu.vector_store %arg2[%c1, %c0_8, %c0_9], %19 {strides = array<i32>} : memref<12x16x128xf32, #tpu.memory_space<vmem>>, vector<1x16x128xf32>,
    %20 = math.cos %15 : vector<16x128xf32>
    %c7 = arith.constant 7 : index
    %c0_10 = arith.constant 0 : index
    %c0_11 = arith.constant 0 : index
    %21 = vector.load %arg2[%c7, %c0_10, %c0_11] : memref<12x16x128xf32, #tpu.memory_space<vmem>>, vector<1x16x128xf32>
    %22 = vector.shape_cast %21 : vector<1x16x128xf32> to vector<16x128xf32>
    %23 = vector.shape_cast %20 : vector<16x128xf32> to vector<1x16x128xf32>
    tpu.vector_store %arg2[%c7, %c0_10, %c0_11], %23 {strides = array<i32>} : memref<12x16x128xf32, #tpu.memory_space<vmem>>, vector<1x16x128xf32>,
    %cst_12 = arith.constant 6.70206451 : f32
    %24 = vector.broadcast %cst_12 : f32 to vector<16x128xf32>
    %25 = arith.mulf %3, %24 : vector<16x128xf32>
    %26 = math.sin %25 : vector<16x128xf32>
    %c2 = arith.constant 2 : index
    %c0_13 = arith.constant 0 : index
    %c0_14 = arith.constant 0 : index
    %27 = vector.load %arg2[%c2, %c0_13, %c0_14] : memref<12x16x128xf32, #tpu.memory_space<vmem>>, vector<1x16x128xf32>
    %28 = vector.shape_cast %27 : vector<1x16x128xf32> to vector<16x128xf32>
    %29 = vector.shape_cast %26 : vector<16x128xf32> to vector<1x16x128xf32>
    tpu.vector_store %arg2[%c2, %c0_13, %c0_14], %29 {strides = array<i32>} : memref<12x16x128xf32, #tpu.memory_space<vmem>>, vector<1x16x128xf32>,
    %30 = math.cos %25 : vector<16x128xf32>
    %c8 = arith.constant 8 : index
    %c0_15 = arith.constant 0 : index
    %c0_16 = arith.constant 0 : index
    %31 = vector.load %arg2[%c8, %c0_15, %c0_16] : memref<12x16x128xf32, #tpu.memory_space<vmem>>, vector<1x16x128xf32>
    %32 = vector.shape_cast %31 : vector<1x16x128xf32> to vector<16x128xf32>
    %33 = vector.shape_cast %30 : vector<16x128xf32> to vector<1x16x128xf32>
    tpu.vector_store %arg2[%c8, %c0_15, %c0_16], %33 {strides = array<i32>} : memref<12x16x128xf32, #tpu.memory_space<vmem>>, vector<1x16x128xf32>,
    %cst_17 = arith.constant 26.8082581 : f32
    %34 = vector.broadcast %cst_17 : f32 to vector<16x128xf32>
    %35 = arith.mulf %3, %34 : vector<16x128xf32>
    %36 = math.sin %35 : vector<16x128xf32>
    %c3 = arith.constant 3 : index
    %c0_18 = arith.constant 0 : index
    %c0_19 = arith.constant 0 : index
    %37 = vector.load %arg2[%c3, %c0_18, %c0_19] : memref<12x16x128xf32, #tpu.memory_space<vmem>>, vector<1x16x128xf32>
    %38 = vector.shape_cast %37 : vector<1x16x128xf32> to vector<16x128xf32>
    %39 = vector.shape_cast %36 : vector<16x128xf32> to vector<1x16x128xf32>
    tpu.vector_store %arg2[%c3, %c0_18, %c0_19], %39 {strides = array<i32>} : memref<12x16x128xf32, #tpu.memory_space<vmem>>, vector<1x16x128xf32>,
    %40 = math.cos %35 : vector<16x128xf32>
    %c9 = arith.constant 9 : index
    %c0_20 = arith.constant 0 : index
    %c0_21 = arith.constant 0 : index
    %41 = vector.load %arg2[%c9, %c0_20, %c0_21] : memref<12x16x128xf32, #tpu.memory_space<vmem>>, vector<1x16x128xf32>
    %42 = vector.shape_cast %41 : vector<1x16x128xf32> to vector<16x128xf32>
    %43 = vector.shape_cast %40 : vector<16x128xf32> to vector<1x16x128xf32>
    tpu.vector_store %arg2[%c9, %c0_20, %c0_21], %43 {strides = array<i32>} : memref<12x16x128xf32, #tpu.memory_space<vmem>>, vector<1x16x128xf32>,
    %cst_22 = arith.constant 107.233032 : f32
    %44 = vector.broadcast %cst_22 : f32 to vector<16x128xf32>
    %45 = arith.mulf %3, %44 : vector<16x128xf32>
    %46 = math.sin %45 : vector<16x128xf32>
    %c4 = arith.constant 4 : index
    %c0_23 = arith.constant 0 : index
    %c0_24 = arith.constant 0 : index
    %47 = vector.load %arg2[%c4, %c0_23, %c0_24] : memref<12x16x128xf32, #tpu.memory_space<vmem>>, vector<1x16x128xf32>
    %48 = vector.shape_cast %47 : vector<1x16x128xf32> to vector<16x128xf32>
    %49 = vector.shape_cast %46 : vector<16x128xf32> to vector<1x16x128xf32>
    tpu.vector_store %arg2[%c4, %c0_23, %c0_24], %49 {strides = array<i32>} : memref<12x16x128xf32, #tpu.memory_space<vmem>>, vector<1x16x128xf32>,
    %50 = math.cos %45 : vector<16x128xf32>
    %c10 = arith.constant 10 : index
    %c0_25 = arith.constant 0 : index
    %c0_26 = arith.constant 0 : index
    %51 = vector.load %arg2[%c10, %c0_25, %c0_26] : memref<12x16x128xf32, #tpu.memory_space<vmem>>, vector<1x16x128xf32>
    %52 = vector.shape_cast %51 : vector<1x16x128xf32> to vector<16x128xf32>
    %53 = vector.shape_cast %50 : vector<16x128xf32> to vector<1x16x128xf32>
    tpu.vector_store %arg2[%c10, %c0_25, %c0_26], %53 {strides = array<i32>} : memref<12x16x128xf32, #tpu.memory_space<vmem>>, vector<1x16x128xf32>,
    %cst_27 = arith.constant 428.932129 : f32
    %54 = vector.broadcast %cst_27 : f32 to vector<16x128xf32>
    %55 = arith.mulf %3, %54 : vector<16x128xf32>
    %56 = math.sin %55 : vector<16x128xf32>
    %c5 = arith.constant 5 : index
    %c0_28 = arith.constant 0 : index
    %c0_29 = arith.constant 0 : index
    %57 = vector.load %arg2[%c5, %c0_28, %c0_29] : memref<12x16x128xf32, #tpu.memory_space<vmem>>, vector<1x16x128xf32>
    %58 = vector.shape_cast %57 : vector<1x16x128xf32> to vector<16x128xf32>
    %59 = vector.shape_cast %56 : vector<16x128xf32> to vector<1x16x128xf32>
    tpu.vector_store %arg2[%c5, %c0_28, %c0_29], %59 {strides = array<i32>} : memref<12x16x128xf32, #tpu.memory_space<vmem>>, vector<1x16x128xf32>,
    %60 = math.cos %55 : vector<16x128xf32>
    %c11 = arith.constant 11 : index
    %c0_30 = arith.constant 0 : index
    %c0_31 = arith.constant 0 : index
    %61 = vector.load %arg2[%c11, %c0_30, %c0_31] : memref<12x16x128xf32, #tpu.memory_space<vmem>>, vector<1x16x128xf32>
    %62 = vector.shape_cast %61 : vector<1x16x128xf32> to vector<16x128xf32>
    %63 = vector.shape_cast %60 : vector<16x128xf32> to vector<1x16x128xf32>
    tpu.vector_store %arg2[%c11, %c0_30, %c0_31], %63 {strides = array<i32>} : memref<12x16x128xf32, #tpu.memory_space<vmem>>, vector<1x16x128xf32>,
    return
  }
  func.func @transform_0(%arg0: i32) -> (i32, i32) {
    %c0_i32 = arith.constant 0 : i32
    %c0_i32_0 = arith.constant 0 : i32
    return %arg0, %c0_i32 : i32, i32
  }
  func.func @transform_1(%arg0: i32) -> (i32, i32, i32) {
    %c0_i32 = arith.constant 0 : i32
    %c0_i32_0 = arith.constant 0 : i32
    %c0_i32_1 = arith.constant 0 : i32
    return %c0_i32, %arg0, %c0_i32_0 : i32, i32, i32
  }
}

</mosaic_0001>

<bundles_post_ra>
// kernel: tpu_custom_call.1
= control target key start
LH: loop header
LB: loop body
LE: loop exit
PB: predicated region body
PF: predicated region fallthrough
CT: control target
= control target key end

     0   :  { %6 = vsyncpa [#allocation3], 0  ;;  %s4009_s0 = inlined_call_operand.hbm [shape: f32[16,128], index: 0, kind: input, shape index: {}]   ;;  %s4010_s1 = inlined_call_operand.hbm [shape: f32[12,16,128], index: 1, kind: output, shape index: {}]  }
   0x1   :  { %7 = vsyncpa [#allocation4], 0  ;;  %s2843_s6 = smov [#allocation2]   ;;  %s2795_s10 = scalar_lea.hbm %s4009_s0, 256 }
   0x2   :  { %s13_s7 = sshll.u32 %s2843_s6, 4  ;;  %p2796_p0 = scmp.ne.s32.totalorder %s4009_s0, %s2795_s10  ;;  %s14_s7 = int_to_ptr.vmem [resolvable:$true] %s13_s7 }
   0x3   :  { %p2799_p1 = scmp.lt.u32.totalorder %s2795_s10, %s4009_s0 }
   0x5   :  { %p2801_p2 = pnand %p2799_p1, %p2796_p0 }
   0x7   :  { %2804 = shalt.err (!%p2801_p2)
}
   0x8   :  { %s2805_s15 = scalar_lea.vmem %s14_s7, 256  ;;  %p2810_p4 = scmp.lt.s32.totalorder %s14_s7, %s14_s7 }
   0x9   :  { %p2806_p3 = scmp.ne.s32.totalorder %s14_s7, %s2805_s15  ;;  %p2811_p5 = scmp.lt.s32.totalorder %s2805_s15, %s2805_s15 }
   0xb   :  { %p2812_p6 = por %p2811_p5, %p2810_p4 }
   0xd   :  { %p2813_p7 = pnand %p2812_p6, %p2806_p3 }
   0xf   :  { %2816 = shalt.err (!%p2813_p7)
}
  0x10   :  { %s2844_s16 = smov 128   ;;  %s2845_s17 = smov 8  }
  0x11   :  { %19 = dma.hbm_to_vmem [thread:$0]  %s4009_s0, 256, %s14_s7, [#allocation3], %s2844_s16, %s2844_s16, %s2845_s17  }
  0x12   :  { %2839 = dma.done.wait [#allocation3], 256  }
  0x13   :  { %2840 = vsyncadd [#allocation3], 4294967040  ;;  %v23_v0 = vld [vmem:[#allocation2] sm:$0xff]  ;;  %v24_v1 = vld [vmem:[#allocation2 + $0x8] sm:$0xff]  ;;  %v2846_v45 = vmov 683565275  }
  0x14   :  { %v25_v2 = vadd.f32 1e-08, %v23_v0  ;;  %v26_v3 = vadd.f32 1e-08, %v24_v1  ;;  %v2847_v47 = vmov 2475754826  }
  0x15   :  { %v2848_v49 = vmov 2131351028   ;;  %v2849_v51 = vmov 2102212464   ;;  %v2850_v53 = vmov 920167782  }
  0x16   :  { %2743 = vrsqrt.f32 %v25_v2  ;;  %vm29_vm0 = vcmp.eq.f32.partialorder %v25_v2, inf  ;;  %v32_v5 = vand.u32 2147483648, %v25_v2  ;;  %vm31_vm1 = vcmp.eq.f32.partialorder %v25_v2, 0.0  ;;  %s2852_s0 = smov [#allocation5]  }
  0x17   :  { %2745 = vrsqrt.f32 %v26_v3  ;;  %vm36_vm2 = vcmp.eq.f32.partialorder %v26_v3, inf  ;;  %v39_v8 = vand.u32 2147483648, %v26_v3  ;;  %vm38_vm3 = vcmp.eq.f32.partialorder %v26_v3, 0.0  ;;  %s2577_s20 = sshll.u32 %s2852_s0, 4  ;;  %s2578_s20 = int_to_ptr.vmem [resolvable:$true] %s2577_s20 }
  0x18   :  { %v2851_v61 = vmov 1326507024   ;;  %s2817_s21 = scalar_lea.vmem %s2578_s20, 3072  ;;  %p2822_p9 = scmp.lt.s32.totalorder %s2578_s20, %s2578_s20 }
  0x19   :  { %p2818_p8 = scmp.ne.s32.totalorder %s2578_s20, %s2817_s21  ;;  %p2823_p10 = scmp.lt.s32.totalorder %s2817_s21, %s2817_s21 }
  0x1b   :  { %p2824_p11 = por %p2823_p10, %p2822_p9 }
  0x1d   :  { %p2825_p12 = pnand %p2824_p11, %p2818_p8 }
  0x20   :  { %v2744_v4 = vpop.eup %2743 }
  0x21   :  { %v2746_v6 = vpop.eup %2745  ;;  %v28_v7 = vmul.f32 %v2744_v4, %v25_v2 }
  0x22   :  { %v35_v9 = vmul.f32 %v2746_v6, %v26_v3 }
  0x23   :  { %v30_v10 = vsel %vm29_vm0, %v25_v2, %v28_v7 }
  0x24   :  { %v2878_v11 = vsel %vm31_vm1, %v32_v5, %v30_v10  ;;  %v37_v12 = vsel %vm36_vm2, %v26_v3, %v35_v9 }
  0x25   :  { %v2881_v13 = vmul.f32 0.41887903, %v2878_v11  ;;  %v2883_v14 = vsel %vm38_vm3, %v39_v8, %v37_v12  ;;  %v2889_v16 = vmul.f32 1.6755161, %v2878_v11 }
  0x26   :  { %v2886_v15 = vmul.f32 0.41887903, %v2883_v14  ;;  %v2901_v35 = vmul.f32 1.6755161, %v2883_v14 }
  0x27   :  { %v43_v17 = vand.u32 2147483647, %v2881_v13  ;;  %v46_v18 = vand.u32 2139095040, %v2881_v13  ;;  %v467_v25 = vand.u32 2139095040, %v2889_v16  ;;  %v464_v39 = vand.u32 2147483647, %v2889_v16 }
  0x28   :  { %v147_v19 = vand.u32 2147483647, %v2886_v15  ;;  %v150_v20 = vand.u32 2139095040, %v2886_v15  ;;  %vm45_vm1 = vcmp.lt.s32.totalorder %v2881_v13, 0 }
  0x29   :  { %v47_v21 = vshrl.u32 %v46_v18, 23  ;;  %v50_v22 = vand.u32 8388607, %v43_v17  ;;  %v468_v28 = vshrl.u32 %v467_v25, 23  ;;  %vm3004_vm2 = vcmp.le.f32.partialorder %v43_v17, 0.7853982 }
  0x2a   :  { %v151_v23 = vshrl.u32 %v150_v20, 23  ;;  %v154_v24 = vand.u32 8388607, %v147_v19 }
  0x2b   :  { %v2589_v26 = vadd.s32 4294967169, %v47_v21  ;;  %v51_v30 = vor.u32 8388608, %v50_v22  ;;  %v2605_v33 = vadd.s32 4294967169, %v468_v28 }
  0x2c   :  { %v2593_v27 = vadd.s32 4294967169, %v151_v23  ;;  %v155_v31 = vor.u32 8388608, %v154_v24 }
  0x2d   :  { %v53_v29 = vadd.s32 1, %v2589_v26  ;;  %v2904_v40 = vshll.u32 %v51_v30, 8  ;;  %v2908_v43 = vadd.s32 1, %v2605_v33 }
  0x2e   :  { %v157_v32 = vadd.s32 1, %v2593_v27  ;;  %v2906_v42 = vshll.u32 %v155_v31, 8 }
  0x2f   :  { %vm54_vm4 = vcmp.gt.s32.totalorder %v53_v29, 0  ;;  %vm475_vm10 = vcmp.gt.s32.totalorder %v2908_v43, 0 }
  0x30   :  { %v55_v34 = vsel %vm54_vm4, %v53_v29, 0  ;;  %vm158_vm5 = vcmp.gt.s32.totalorder %v157_v32, 0  ;;  %vm149_vm4 = vcmp.lt.s32.totalorder %v2886_v15, 0 }
  0x31   :  { %v56_v36 = vshrl.u32 %v55_v34, 5  ;;  %v57_v37 = vand.u32 31, %v55_v34  ;;  %v159_v38 = vsel %vm158_vm5, %v157_v32, 0 }
  0x32   :  { %v161_v41 = vand.u32 31, %v159_v38  ;;  %v2915_v55 = vshrl.u32 %v159_v38, 5 }
  0x33   :  { %v58_v44 = vsub.s32 32, %v57_v37  ;;  %v60_v46 = vshll.u32 %v2846_v45, %v57_v37  ;;  %v63_v48 = vshll.u32 %v2847_v47, %v57_v37  ;;  %v66_v50 = vshll.u32 %v2848_v49, %v57_v37 }
  0x34   :  { %v69_v52 = vshll.u32 %v2849_v51, %v57_v37  ;;  %v72_v54 = vshll.u32 %v2850_v53, %v57_v37  ;;  %vm75_vm6 = vcmp.lt.s32.totalorder %v56_v36, 1  ;;  %vm76_vm7 = vcmp.lt.s32.totalorder %v56_v36, 2 }
  0x35   :  { %v59_v56 = vshrl.u32 %v2846_v45, %v58_v44  ;;  %v61_v57 = vshrl.u32 %v2847_v47, %v58_v44  ;;  %v64_v58 = vshrl.u32 %v2848_v49, %v58_v44  ;;  %v67_v59 = vshrl.u32 %v2849_v51, %v58_v44 }
  0x36   :  { %v70_v60 = vshrl.u32 %v2850_v53, %v58_v44  ;;  %v73_v62 = vshrl.u32 %v2851_v61, %v58_v44  ;;  %vm78_vm8 = vcmp.lt.s32.totalorder %v56_v36, 4  ;;  %v162_v2 = vsub.s32 32, %v161_v41 }
  0x37   :  { %v62_v63 = vor.u32 %v61_v57, %v60_v46  ;;  %v65_v0 = vor.u32 %v64_v58, %v63_v48  ;;  %v68_v1 = vor.u32 %v67_v59, %v66_v50  ;;  %vm77_vm9 = vcmp.lt.s32.totalorder %v56_v36, 3 }
  0x38   :  { %v71_v3 = vor.u32 %v70_v60, %v69_v52  ;;  %v74_v4 = vor.u32 %v73_v62, %v72_v54  ;;  %v164_v5 = vshll.u32 %v2846_v45, %v161_v41  ;;  %v167_v20 = vshll.u32 %v2847_v47, %v161_v41 }
  0x39   :  { %v79_v6 = vsel %vm75_vm6, %v59_v56, %v62_v63  ;;  %v80_v7 = vsel %vm78_vm8, %v68_v1, 2102212464  ;;  %v83_v8 = vsel %vm75_vm6, %v62_v63, %v65_v0  ;;  %v87_v9 = vsel %vm75_vm6, %v65_v0, %v68_v1 }
  0x3a   :  { %v81_v10 = vsel %vm77_vm9, %v65_v0, %v80_v7  ;;  %v84_v12 = vsel %vm78_vm8, %v71_v3, 920167782  ;;  %v88_v18 = vsel %vm78_vm8, %v74_v4, 1326507024  ;;  %v163_v23 = vshrl.u32 %v2846_v45, %v162_v2 }
  0x3b   :  { %v85_v21 = vsel %vm77_vm9, %v68_v1, %v84_v12  ;;  %v89_v22 = vsel %vm77_vm9, %v71_v3, %v88_v18  ;;  %v165_v24 = vshrl.u32 %v2847_v47, %v162_v2  ;;  %v82_v25 = vsel %vm76_vm7, %v79_v6, %v81_v10 }
  0x3c   :  { %v86_v26 = vsel %vm76_vm7, %v83_v8, %v85_v21  ;;  %v90_v27 = vsel %vm76_vm7, %v87_v9, %v89_v22  ;;  %v168_v28 = vshrl.u32 %v2848_v49, %v162_v2  ;;  %v170_v37 = vshll.u32 %v2848_v49, %v161_v41 }
  0x3d   :  { %v2936_v29 = vmul.u32.u64.low %v2904_v40, %v90_v27  ;;  %v2937_v30 = vmul.u32.u64.high %v2904_v40, %v90_v27, %v2936_v29  ;;  %v2940_v31 = vmul.u32.u64.low %v2904_v40, %v86_v26  ;;  %v2941_v32 = vmul.u32.u64.high %v2904_v40, %v86_v26, %v2940_v31 }
  0x3e   :  { %v166_v33 = vor.u32 %v165_v24, %v164_v5  ;;  %v169_v34 = vor.u32 %v168_v28, %v167_v20  ;;  %v171_v38 = vshrl.u32 %v2849_v51, %v162_v2  ;;  %v173_v36 = vshll.u32 %v2849_v51, %v161_v41 }
  0x3f   :  { %v174_v44 = vshrl.u32 %v2850_v53, %v162_v2  ;;  %v176_v46 = vshll.u32 %v2850_v53, %v161_v41  ;;  %v177_v48 = vshrl.u32 %v2851_v61, %v162_v2  ;;  %v98_v50 = vmul.u32 %v2904_v40, %v82_v25 }
  0x40   :  { %v172_v52 = vor.u32 %v171_v38, %v170_v37  ;;  %vm179_vm11 = vcmp.lt.s32.totalorder %v2915_v55, 1  ;;  %vm180_vm12 = vcmp.lt.s32.totalorder %v2915_v55, 2  ;;  %vm100_vm13 = vc.u32 %v2937_v30, %v2940_v31 }
  0x41   :  { %v101_v54 = vadd.s32 1, %v2941_v32  ;;  %v175_v56 = vor.u32 %v174_v44, %v173_v36  ;;  %vm181_vm14 = vcmp.lt.s32.totalorder %v2915_v55, 3  ;;  %v178_v57 = vor.u32 %v177_v48, %v176_v46 }
  0x42   :  { %vm182_vm15 = vcmp.lt.s32.totalorder %v2915_v55, 4  ;;  %v183_v41 = vsel %vm179_vm11, %v163_v23, %v166_v33  ;;  %v187_v58 = vsel %vm179_vm11, %v166_v33, %v169_v34  ;;  %v191_v62 = vsel %vm179_vm11, %v169_v34, %v172_v52 }
  0x43   :  { %v102_v40 = vsel %vm100_vm13, %v101_v54, %v2941_v32  ;;  %v184_v59 = vsel %vm182_vm15, %v172_v52, 2102212464  ;;  %v188_v60 = vsel %vm182_vm15, %v175_v56, 920167782  ;;  %v192_v2 = vsel %vm182_vm15, %v178_v57, 1326507024 }
  0x44   :  { %v103_v63 = vadd.s32 %v102_v40, %v98_v50  ;;  %v185_v0 = vsel %vm181_vm14, %v169_v34, %v184_v59  ;;  %v189_v1 = vsel %vm181_vm14, %v172_v52, %v188_v60  ;;  %v193_v5 = vsel %vm181_vm14, %v175_v56, %v192_v2 }
  0x45   :  { %v186_v3 = vsel %vm180_vm12, %v183_v41, %v185_v0  ;;  %v190_v4 = vsel %vm180_vm12, %v187_v58, %v189_v1  ;;  %v476_v6 = vsel %vm475_vm10, %v2908_v43, 0  ;;  %v194_v8 = vsel %vm180_vm12, %v191_v62, %v193_v5 }
  0x46   :  { %v104_v7 = vadd.s32 536870912, %v103_v63  ;;  %v2969_v9 = vmul.u32.u64.low %v2906_v42, %v190_v4  ;;  %v2970_v10 = vmul.u32.u64.high %v2906_v42, %v190_v4, %v2969_v9  ;;  %v471_v20 = vand.u32 8388607, %v464_v39 }
  0x47   :  { %v2974_v12 = vmul.u32.u64.low %v2906_v42, %v194_v8  ;;  %v2975_v18 = vmul.u32.u64.high %v2906_v42, %v194_v8, %v2974_v12  ;;  %v571_v21 = vand.u32 2139095040, %v2901_v35  ;;  %v478_v43 = vand.u32 31, %v476_v6 }
  0x48   :  { %v105_v22 = vshrl.u32 %v104_v7, 30  ;;  %v202_v23 = vmul.u32 %v2906_v42, %v186_v3  ;;  %v205_v24 = vadd.s32 1, %v2970_v10  ;;  %v568_v25 = vand.u32 2147483647, %v2901_v35 }
  0x49   :  { %vm204_vm0 = vc.u32 %v2975_v18, %v2969_v9  ;;  %v472_v26 = vor.u32 8388608, %v471_v20  ;;  %v572_v27 = vshrl.u32 %v571_v21, 23  ;;  %v479_v32 = vsub.s32 32, %v478_v43 }
  0x4a   :  { %v106_v55 = vshll.u32 %v105_v22, 30  ;;  %v206_v29 = vsel %vm204_vm0, %v205_v24, %v2970_v10  ;;  %v2988_v34 = vshrl.u32 %v476_v6, 5  ;;  %v2991_v42 = vmul.f32 6.7020645, %v2878_v11 }
  0x4b   :  { %v207_v33 = vadd.s32 %v206_v29, %v202_v23  ;;  %v2997_v38 = vand.u32 8388607, %v568_v25  ;;  %v3000_v36 = vmul.f32 6.7020645, %v2883_v14  ;;  %v99_v46 = vadd.s32 %v2940_v31, %v2937_v30 }
  0x4c   :  { %v2985_v28 = vsub.s32 %v103_v63, %v106_v55  ;;  %v3010_v50 = vshll.u32 %v472_v26, 8  ;;  %v3012_v52 = vadd.s32 4294967169, %v572_v27  ;;  %v129_v56 = vsub.s32 4, %v105_v22 }
  0x4d   :  { %v208_v48 = vadd.s32 536870912, %v207_v33  ;;  %v487_v57 = vshll.u32 %v2848_v49, %v478_v43  ;;  %v488_v41 = vshrl.u32 %v2849_v51, %v479_v32  ;;  %v481_v17 = vshll.u32 %v2846_v45, %v478_v43 }
  0x4e   :  { %v109_v37 = vsub.s32 0, %v2985_v28  ;;  %v482_v40 = vshrl.u32 %v2847_v47, %v479_v32  ;;  %vm496_vm3 = vcmp.lt.s32.totalorder %v2988_v34, 1  ;;  %v484_v31 = vshll.u32 %v2847_v47, %v478_v43 }
  0x4f   :  { %v209_v58 = vshrl.u32 %v208_v48, 30  ;;  %v485_v59 = vshrl.u32 %v2848_v49, %v479_v32  ;;  %v490_v60 = vshll.u32 %v2849_v51, %v478_v43  ;;  %v491_v63 = vshrl.u32 %v2850_v53, %v479_v32 }
  0x50   :  { %v2590_v54 = vmin.u32 %v109_v37, %v2985_v28  ;;  %vm497_vm5 = vcmp.lt.s32.totalorder %v2988_v34, 2  ;;  %vm499_vm6 = vcmp.lt.s32.totalorder %v2988_v34, 4  ;;  %v130_v1 = vsel %vm45_vm1, %v129_v56, %v105_v22 }
  0x51   :  { %v210_v62 = vshll.u32 %v209_v58, 30  ;;  %v480_v2 = vshrl.u32 %v2846_v45, %v479_v32  ;;  %v489_v3 = vor.u32 %v488_v41, %v487_v57  ;;  %v483_v5 = vor.u32 %v482_v40, %v481_v17 }
  0x52   :  { %v111_v30 = vclz %v2590_v54  ;;  %v493_v6 = vshll.u32 %v2850_v53, %v478_v43  ;;  %v494_v7 = vshrl.u32 %v2851_v61, %v479_v32  ;;  %v486_v8 = vor.u32 %v485_v59, %v484_v31 }
  0x53   :  { %v3030_v4 = vsub.s32 %v207_v33, %v210_v62  ;;  %v492_v10 = vor.u32 %v491_v63, %v490_v60  ;;  %v501_v12 = vsel %vm499_vm6, %v489_v3, 2102212464  ;;  %v233_v22 = vsub.s32 4, %v209_v58 }
  0x54   :  { %v2591_v0 = vadd.s32 4294967294, %v111_v30  ;;  %vm498_vm8 = vcmp.lt.s32.totalorder %v2988_v34, 3  ;;  %v132_v43 = vsel %vm3004_vm2, 0, %v130_v1  ;;  %v495_v27 = vor.u32 %v494_v7, %v493_v6 }
  0x55   :  { %v213_v21 = vsub.s32 0, %v3030_v4  ;;  %v500_v29 = vsel %vm496_vm3, %v480_v2, %v483_v5  ;;  %v502_v32 = vsel %vm498_vm8, %v486_v8, %v501_v12  ;;  %vm3048_vm9 = vcmp.le.f32.partialorder %v147_v19, 0.7853982 }
  0x56   :  { %vm2592_vm7 = vcmp.lt.s32.totalorder %v2591_v0, 0  ;;  %v505_v54 = vsel %vm499_vm6, %v492_v10, 920167782  ;;  %v136_v56 = vadd.s32 3, %v132_v43  ;;  %v203_v57 = vadd.s32 %v2969_v9, %v2975_v18 }
  0x57   :  { %v114_v20 = vsel %vm2592_vm7, 0, %v2591_v0  ;;  %v2594_v26 = vmin.u32 %v213_v21, %v3030_v4  ;;  %v506_v19 = vsel %vm498_vm8, %v489_v3, %v505_v54  ;;  %v508_v30 = vsel %vm496_vm3, %v486_v8, %v489_v3 }
  0x58   :  { %v115_v23 = vsub.s32 32, %v114_v20  ;;  %v116_v55 = vshll.u32 %v2985_v28, %v114_v20  ;;  %v119_v24 = vsub.s32 4294967266, %v114_v20  ;;  %v504_v28 = vsel %vm496_vm3, %v483_v5, %v486_v8 }
  0x59   :  { %v215_v41 = vclz %v2594_v26  ;;  %v503_v59 = vsel %vm497_vm5, %v500_v29, %v502_v32  ;;  %v507_v60 = vsel %vm497_vm5, %v504_v28, %v506_v19  ;;  %v509_v9 = vsel %vm499_vm6, %v495_v27, 1326507024 }
  0x5a   :  { %v117_v33 = vshrl.u32 %v99_v46, %v115_v23  ;;  %v120_v37 = vadd.s32 127, %v119_v24  ;;  %v234_v46 = vsel %vm149_vm4, %v233_v22, %v209_v58  ;;  %v510_v62 = vsel %vm498_vm8, %v492_v10, %v509_v9 }
  0x5b   :  { %v2595_v31 = vadd.s32 4294967294, %v215_v41  ;;  %v578_v63 = vadd.s32 1, %v3012_v52  ;;  %v511_v0 = vsel %vm497_vm5, %v508_v30, %v510_v62  ;;  %v519_v34 = vmul.u32 %v3010_v50, %v503_v59 }
  0x5c   :  { %v118_v17 = vor.u32 %v117_v33, %v116_v55  ;;  %v121_v40 = vshll.u32 %v120_v37, 23  ;;  %v3076_v1 = vmul.u32.u64.low %v3010_v50, %v507_v60  ;;  %v3077_v2 = vmul.u32.u64.high %v3010_v50, %v507_v60, %v3076_v1 }
  0x5d   :  { %vm2596_vm10 = vcmp.lt.s32.totalorder %v2595_v31, 0  ;;  %v3081_v6 = vmul.u32.u64.low %v3010_v50, %v511_v0  ;;  %v3082_v7 = vmul.u32.u64.high %v3010_v50, %v511_v0, %v3081_v6  ;;  %vm579_vm11 = vcmp.gt.s32.totalorder %v578_v63, 0 }
  0x5e   :  { %v122_v18 = vor.u32 4788187, %v121_v40  ;;  %v125_v58 = vcvt.s32.f32 %v118_v17  ;;  %v218_v5 = vsel %vm2596_vm10, 0, %v2595_v31  ;;  %v576_v20 = vor.u32 8388608, %v2997_v38 }
  0x5f   :  { %v219_v8 = vsub.s32 32, %v218_v5  ;;  %v220_v10 = vshll.u32 %v3030_v4, %v218_v5  ;;  %v223_v12 = vsub.s32 4294967266, %v218_v5  ;;  %v580_v21 = vsel %vm579_vm11, %v578_v63, 0 }
  0x60   :  { %v123_v3 = vand.u32 2147483647, %v122_v18  ;;  %v236_v55 = vsel %vm3048_vm9, 0, %v234_v46  ;;  %v522_v24 = vadd.s32 1, %v3077_v2  ;;  %v3090_v27 = vand.u32 3, %v132_v43 }
  0x61   :  { %v221_v22 = vshrl.u32 %v203_v57, %v219_v8  ;;  %v224_v23 = vadd.s32 127, %v223_v12  ;;  %vm521_vm12 = vc.u32 %v3082_v7, %v3076_v1  ;;  %v582_v4 = vand.u32 31, %v580_v21 }
  0x62   :  { %v126_v52 = vmul.f32 %v125_v58, %v123_v3  ;;  %v3094_v29 = vand.u32 3, %v136_v56  ;;  %v523_v33 = vsel %vm521_vm12, %v522_v24, %v3077_v2  ;;  %v240_v28 = vadd.s32 3, %v236_v55 }
  0x63   :  { %v222_v50 = vor.u32 %v221_v22, %v220_v10  ;;  %v225_v32 = vshll.u32 %v224_v23, 23  ;;  %v524_v54 = vadd.s32 %v523_v33, %v519_v34  ;;  %v583_v57 = vsub.s32 32, %v582_v4 }
  0x64   :  { %v127_v26 = vxor.u32 2147483648, %v126_v52  ;;  %v3102_v17 = vshrl.u32 %v580_v21, 5  ;;  %v585_v40 = vshll.u32 %v2846_v45, %v582_v4  ;;  %v588_v19 = vshll.u32 %v2847_v47, %v582_v4 }
  0x65   :  { %v226_v41 = vor.u32 4788187, %v225_v32  ;;  %v229_v46 = vcvt.s32.f32 %v222_v50  ;;  %v525_v56 = vadd.s32 536870912, %v524_v54  ;;  %v586_v31 = vshrl.u32 %v2847_v47, %v583_v57 }
  0x66   :  { %v128_v37 = vsel %vm45_vm1, %v127_v26, %v126_v52  ;;  %v589_v59 = vshrl.u32 %v2848_v49, %v583_v57  ;;  %vm351_vm13 = vcmp.eq.s32.totalorder %v3090_v27, 2  ;;  %v591_v60 = vshll.u32 %v2848_v49, %v582_v4 }
  0x67   :  { %v131_v43 = vsel %vm3004_vm2, %v2881_v13, %v128_v37  ;;  %v227_v30 = vand.u32 2147483647, %v226_v41  ;;  %v3109_v44 = vshrl.u32 %v525_v56, 30  ;;  %v592_v9 = vshrl.u32 %v2849_v51, %v583_v57 }
  0x68   :  { %2747 = vcosq.f32 %v131_v43  ;;  %v594_v18 = vshll.u32 %v2849_v51, %v582_v4  ;;  %vm139_vm14 = vcmp.eq.s32.totalorder %v3094_v29, 0  ;;  %vm348_vm15 = vcmp.eq.s32.totalorder %v3090_v27, 0 }
  0x69   :  { %2749 = vsinq.f32 %v131_v43  ;;  %v230_v58 = vmul.f32 %v229_v46, %v227_v30  ;;  %v595_v62 = vshrl.u32 %v2850_v53, %v583_v57  ;;  %v597_v63 = vshll.u32 %v2850_v53, %v582_v4 }
  0x6a   :  { %vm138_vm0 = vcmp.lt.s32.totalorder %v3094_v29, 2  ;;  %vm142_vm1 = vcmp.eq.s32.totalorder %v3094_v29, 2  ;;  %vm347_vm2 = vcmp.lt.s32.totalorder %v3090_v27, 2  ;;  %v3121_v0 = vand.u32 3, %v236_v55 }
  0x6b   :  { %v527_v2 = vshll.u32 %v3109_v44, 30  ;;  %v598_v3 = vshrl.u32 %v2851_v61, %v583_v57  ;;  %vm135_vm3 = vweird.f32 %v2881_v13  ;;  %v231_v5 = vxor.u32 2147483648, %v230_v58 }
  0x6c   :  { %v3126_v6 = vand.u32 3, %v240_v28  ;;  %v587_v8 = vor.u32 %v586_v31, %v585_v40  ;;  %v596_v10 = vor.u32 %v595_v62, %v594_v18  ;;  %v590_v52 = vor.u32 %v589_v59, %v588_v19 }
  0x6d   :  { %v3128_v12 = vsub.s32 %v524_v54, %v527_v2  ;;  %v593_v34 = vor.u32 %v592_v9, %v591_v60  ;;  %vm603_vm5 = vcmp.lt.s32.totalorder %v3102_v17, 4  ;;  %v232_v21 = vsel %vm149_vm4, %v231_v5, %v230_v58 }
  0x6e   :  { %v599_v22 = vor.u32 %v598_v3, %v597_v63  ;;  %vm600_vm6 = vcmp.lt.s32.totalorder %v3102_v17, 1  ;;  %vm602_vm7 = vcmp.lt.s32.totalorder %v3102_v17, 3  ;;  %v235_v23 = vsel %vm3048_vm9, %v2886_v15, %v232_v21 }
  0x6f   :  { %vm466_vm8 = vcmp.lt.s32.totalorder %v2889_v16, 0  ;;  %v530_v55 = vsub.s32 0, %v3128_v12  ;;  %v584_v24 = vshrl.u32 %v2846_v45, %v583_v57  ;;  %v3143_v26 = vshll.u32 %v576_v20, 8 }
  0x70   :  { %2751 = vcosq.f32 %v235_v23  ;;  %vm601_vm4 = vcmp.lt.s32.totalorder %v3102_v17, 2  ;;  %v605_v4 = vsel %vm603_vm5, %v593_v34, 2102212464  ;;  %v609_v48 = vsel %vm603_vm5, %v596_v10, 920167782 }
  0x71   :  { %2753 = vsinq.f32 %v235_v23  ;;  %v2606_v32 = vmin.u32 %v530_v55, %v3128_v12  ;;  %v608_v33 = vsel %vm600_vm6, %v587_v8, %v590_v52  ;;  %v610_v38 = vsel %vm602_vm7, %v593_v34, %v609_v48 }
  0x72   :  { %v2748_v50 = vpop.eup %2747  ;;  %v550_v28 = vsub.s32 4, %v3109_v44  ;;  %v612_v54 = vsel %vm600_vm6, %v590_v52, %v593_v34  ;;  %v613_v57 = vsel %vm603_vm5, %v599_v22, 1326507024  ;;  %vm451_vm9 = vcmp.eq.s32.totalorder %v3121_v0, 0 }
  0x73   :  { %v2750_v20 = vpop.eup %2749  ;;  %v143_v37 = vxor.u32 2147483648, %v2748_v50  ;;  %vm3163_vm10 = vcmp.le.f32.partialorder %v464_v39, 0.7853982  ;;  %v532_v46 = vclz %v2606_v32  ;;  %v604_v56 = vsel %vm600_vm6, %v584_v24, %v587_v8 }
  0x74   :  { %v140_v43 = vxor.u32 2147483648, %v2750_v20  ;;  %v606_v40 = vsel %vm602_vm7, %v590_v52, %v605_v4  ;;  %vm450_vm11 = vcmp.lt.s32.totalorder %v3121_v0, 2  ;;  %v611_v39 = vsel %vm601_vm4, %v608_v33, %v610_v38 }
  0x75   :  { %v144_v19 = vsel %vm142_vm1, %v143_v37, %v2750_v20  ;;  %v353_v30 = vsel %vm351_vm13, %v143_v37, %v2750_v20  ;;  %v614_v31 = vsel %vm602_vm7, %v596_v10, %v613_v57  ;;  %vm239_vm12 = vweird.f32 %v2886_v15 }
  0x76   :  { %v141_v59 = vsel %vm139_vm14, %v2748_v50, %v140_v43  ;;  %v350_v60 = vsel %vm348_vm15, %v2748_v50, %v140_v43  ;;  %v2607_v9 = vadd.s32 4294967294, %v532_v46  ;;  %v615_v18 = vsel %vm601_vm4, %v612_v54, %v614_v31 }
  0x77   :  { %v145_v58 = vsel %vm138_vm0, %v141_v59, %v144_v19  ;;  %v354_v62 = vsel %vm347_vm2, %v350_v60, %v353_v30  ;;  %v3192_v63 = vmul.u32.u64.low %v3143_v26, %v615_v18  ;;  %v3193_v2 = vmul.u32.u64.high %v3143_v26, %v615_v18, %v3192_v63 }
  0x78   :  { %v146_v3 = vsel %vm135_vm3, nan, %v145_v58  ;;  %v355_v5 = vsel %vm135_vm3, nan, %v354_v62  ;;  %v520_v8 = vadd.s32 %v3076_v1, %v3082_v7  ;;  %vm2608_vm13 = vcmp.lt.s32.totalorder %v2607_v9, 0 }
  0x79   :  { %251 = vst [vmem:[#allocation5] sm:$0xff] %v146_v3  ;;  %460 = vst [vmem:[#allocation5 + $0x60] sm:$0xff] %v355_v5  ;;  %v535_v29 = vsel %vm2608_vm13, 0, %v2607_v9  ;;  %v551_v27 = vsel %vm466_vm8, %v550_v28, %v3109_v44  ;;  %v3205_v10 = vmul.u32.u64.low %v3143_v26, %v611_v39  ;;  %v3206_v52 = vmul.u32.u64.high %v3143_v26, %v611_v39, %v3205_v10 }
  0x7a   :  { %v536_v34 = vsub.s32 32, %v535_v29  ;;  %v537_v13 = vshll.u32 %v3128_v12, %v535_v29  ;;  %v540_v21 = vsub.s32 4294967266, %v535_v29  ;;  %v607_v1 = vsel %vm601_vm4, %v604_v56, %v606_v40  ;;  %v2752_v7 = vpop.eup %2751 }
  0x7b   :  { %vm242_vm14 = vcmp.lt.s32.totalorder %v3126_v6, 2  ;;  %vm243_vm15 = vcmp.eq.s32.totalorder %v3126_v6, 0  ;;  %vm246_vm0 = vcmp.eq.s32.totalorder %v3126_v6, 2  ;;  %vm454_vm1 = vcmp.eq.s32.totalorder %v3121_v0, 2  ;;  %v2754_v44 = vpop.eup %2753 }
  0x7c   :  { %v247_v22 = vxor.u32 2147483648, %v2752_v7  ;;  %v538_v23 = vshrl.u32 %v520_v8, %v536_v34  ;;  %v541_v55 = vadd.s32 127, %v540_v21  ;;  %vm625_vm2 = vc.u32 %v3193_v2, %v3205_v10 }
  0x7d   :  { %v244_v12 = vxor.u32 2147483648, %v2754_v44  ;;  %v553_v17 = vsel %vm3163_vm10, 0, %v551_v27  ;;  %v623_v24 = vmul.u32 %v3143_v26, %v607_v1  ;;  %v626_v4 = vadd.s32 1, %v3206_v52 }
  0x7e   :  { %v248_v48 = vsel %vm246_vm0, %v247_v22, %v2754_v44  ;;  %v456_v50 = vsel %vm454_vm1, %v247_v22, %v2754_v44  ;;  %v539_v32 = vor.u32 %v538_v23, %v537_v13  ;;  %v542_v33 = vshll.u32 %v541_v55, 23 }
  0x7f   :  { %v245_v38 = vsel %vm243_vm15, %v2752_v7, %v244_v12  ;;  %v453_v20 = vsel %vm451_vm9, %v2752_v7, %v244_v12  ;;  %v627_v37 = vsel %vm625_vm2, %v626_v4, %v3206_v52  ;;  %v889_v28 = vand.u32 2139095040, %v2991_v42 }
  0x80   :  { %v249_v54 = vsel %vm242_vm14, %v245_v38, %v248_v48  ;;  %v457_v26 = vsel %vm450_vm11, %v453_v20, %v456_v50  ;;  %v543_v57 = vor.u32 4788187, %v542_v33  ;;  %v546_v43 = vcvt.s32.f32 %v539_v32 }
  0x81   :  { %v250_v46 = vsel %vm239_vm12, nan, %v249_v54  ;;  %v458_v56 = vsel %vm239_vm12, nan, %v457_v26  ;;  %v628_v40 = vadd.s32 %v627_v37, %v623_v24  ;;  %v890_v19 = vshrl.u32 %v889_v28, 23 }
  0x82   :  { %252 = vst [vmem:[#allocation5 + $0x8] sm:$0xff] %v250_v46  ;;  %461 = vst [vmem:[#allocation5 + $0x68] sm:$0xff] %v458_v56  ;;  %v544_v30 = vand.u32 2147483647, %v543_v57  ;;  %v886_v6 = vand.u32 2147483647, %v2991_v42  ;;  %v624_v22 = vadd.s32 %v3205_v10, %v3193_v2  ;;  %vm556_vm12 = vweird.f32 %v2889_v16 }
  0x83   :  { %v629_v39 = vadd.s32 536870912, %v628_v40  ;;  %v2621_v31 = vadd.s32 4294967169, %v890_v19  ;;  %v993_v0 = vand.u32 2139095040, %v3000_v36  ;;  %v557_v60 = vadd.s32 3, %v553_v17 }
  0x84   :  { %v547_v59 = vmul.f32 %v546_v43, %v544_v30  ;;  %v893_v15 = vand.u32 8388607, %v886_v6  ;;  %v3249_v34 = vand.u32 3, %v553_v17  ;;  %v990_v13 = vand.u32 2147483647, %v3000_v36 }
  0x85   :  { %v630_v9 = vshrl.u32 %v629_v39, 30  ;;  %v896_v18 = vadd.s32 1, %v2621_v31  ;;  %v994_v63 = vshrl.u32 %v993_v0, 23  ;;  %v3242_v5 = vand.u32 3, %v557_v60 }
  0x86   :  { %v548_v58 = vxor.u32 2147483648, %v547_v59  ;;  %vm3254_vm5 = vcmp.le.f32.partialorder %v568_v25, 0.7853982  ;;  %vm570_vm6 = vcmp.lt.s32.totalorder %v2901_v35, 0  ;;  %v894_v7 = vor.u32 8388608, %v893_v15 }
  0x87   :  { %v631_v62 = vshll.u32 %v630_v9, 30  ;;  %vm897_vm3 = vcmp.gt.s32.totalorder %v896_v18, 0  ;;  %v654_v8 = vsub.s32 4, %v630_v9  ;;  %v2625_v44 = vadd.s32 4294967169, %v994_v63 }
  0x88   :  { %v549_v3 = vsel %vm466_vm8, %v548_v58, %v547_v59  ;;  %v898_v29 = vsel %vm897_vm3, %v896_v18, 0  ;;  %vm563_vm7 = vcmp.eq.s32.totalorder %v3242_v5, 2  ;;  %vm560_vm8 = vcmp.eq.s32.totalorder %v3242_v5, 0 }
  0x89   :  { %v552_v27 = vsel %vm3163_vm10, %v2889_v16, %v549_v3  ;;  %v3247_v52 = vsub.s32 %v628_v40, %v631_v62  ;;  %v900_v1 = vand.u32 31, %v898_v29  ;;  %v655_v23 = vsel %vm570_vm6, %v654_v8, %v630_v9 }
  0x8a   :  { %2755 = vcosq.f32 %v552_v27  ;;  %vm770_vm4 = vcmp.eq.s32.totalorder %v3249_v34, 0  ;;  %vm773_vm9 = vcmp.eq.s32.totalorder %v3249_v34, 2  ;;  %v3270_v17 = vshrl.u32 %v898_v29, 5 }
  0x8b   :  { %2757 = vsinq.f32 %v552_v27  ;;  %v634_v41 = vsub.s32 0, %v3247_v52  ;;  %v901_v25 = vsub.s32 32, %v900_v1  ;;  %v903_v55 = vshll.u32 %v2846_v45, %v900_v1 }
  0x8c   :  { %v3274_v24 = vand.u32 8388607, %v990_v13  ;;  %vm559_vm10 = vcmp.lt.s32.totalorder %v3242_v5, 2  ;;  %vm769_vm11 = vcmp.lt.s32.totalorder %v3249_v34, 2  ;;  %v906_v10 = vshll.u32 %v2847_v47, %v900_v1 }
  0x8d   :  { %v2610_v12 = vmin.u32 %v634_v41, %v3247_v52  ;;  %v904_v2 = vshrl.u32 %v2847_v47, %v901_v25  ;;  %v907_v4 = vshrl.u32 %v2848_v49, %v901_v25  ;;  %v909_v48 = vshll.u32 %v2848_v49, %v900_v1 }
  0x8e   :  { %v3285_v32 = vsel %vm3254_vm5, 0, %v655_v23  ;;  %v3287_v33 = vshll.u32 %v894_v7, 8  ;;  %v1000_v38 = vadd.s32 1, %v2625_v44  ;;  %v902_v20 = vshrl.u32 %v2846_v45, %v901_v25 }
  0x8f   :  { %v636_v50 = vclz %v2610_v12  ;;  %v905_v37 = vor.u32 %v904_v2, %v903_v55  ;;  %v910_v28 = vshrl.u32 %v2849_v51, %v901_v25  ;;  %v912_v54 = vshll.u32 %v2849_v51, %v900_v1 }
  0x90   :  { %v913_v57 = vshrl.u32 %v2850_v53, %v901_v25  ;;  %v915_v43 = vshll.u32 %v2850_v53, %v900_v1  ;;  %v916_v46 = vshrl.u32 %v2851_v61, %v901_v25  ;;  %v908_v56 = vor.u32 %v907_v4, %v906_v10 }
  0x91   :  { %v2611_v26 = vadd.s32 4294967294, %v636_v50  ;;  %v911_v40 = vor.u32 %v910_v28, %v909_v48  ;;  %vm918_vm13 = vcmp.lt.s32.totalorder %v3270_v17, 1  ;;  %vm919_vm14 = vcmp.lt.s32.totalorder %v3270_v17, 2 }
  0x92   :  { %v914_v19 = vor.u32 %v913_v57, %v912_v54  ;;  %vm920_vm0 = vcmp.lt.s32.totalorder %v3270_v17, 3  ;;  %vm921_vm1 = vcmp.lt.s32.totalorder %v3270_v17, 4  ;;  %v917_v31 = vor.u32 %v916_v46, %v915_v43 }
  0x93   :  { %vm2612_vm15 = vcmp.lt.s32.totalorder %v2611_v26, 0  ;;  %v922_v0 = vsel %vm918_vm13, %v902_v20, %v905_v37  ;;  %v923_v59 = vsel %vm921_vm1, %v911_v40, 2102212464  ;;  %v926_v3 = vsel %vm918_vm13, %v905_v37, %v908_v56 }
  0x94   :  { %v2756_v30 = vpop.eup %2755  ;;  %v639_v39 = vsel %vm2612_vm15, 0, %v2611_v26  ;;  %v924_v63 = vsel %vm920_vm0, %v908_v56, %v923_v59  ;;  %v927_v8 = vsel %vm921_vm1, %v914_v19, 920167782  ;;  %v930_v23 = vsel %vm918_vm13, %v908_v56, %v911_v40 }
  0x95   :  { %v2758_v60 = vpop.eup %2757  ;;  %v564_v9 = vxor.u32 2147483648, %v2756_v30  ;;  %v640_v18 = vsub.s32 32, %v639_v39  ;;  %v641_v58 = vshll.u32 %v3247_v52, %v639_v39  ;;  %v644_v62 = vsub.s32 4294967266, %v639_v39 }
  0x96   :  { %v561_v15 = vxor.u32 2147483648, %v2758_v60  ;;  %v928_v44 = vsel %vm920_vm0, %v911_v40, %v927_v8  ;;  %v931_v48 = vsel %vm921_vm1, %v917_v31, 1326507024  ;;  %v925_v34 = vsel %vm919_vm14, %v922_v0, %v924_v63 }
  0x97   :  { %v565_v29 = vsel %vm563_vm7, %v564_v9, %v2758_v60  ;;  %v642_v27 = vshrl.u32 %v624_v22, %v640_v18  ;;  %v645_v1 = vadd.s32 127, %v644_v62  ;;  %v775_v41 = vsel %vm773_vm9, %v564_v9, %v2758_v60 }
  0x98   :  { %v562_v52 = vsel %vm560_vm8, %v2756_v30, %v561_v15  ;;  %v772_v7 = vsel %vm770_vm4, %v2756_v30, %v561_v15  ;;  %v929_v4 = vsel %vm919_vm14, %v926_v3, %v928_v44  ;;  %v932_v20 = vsel %vm920_vm0, %v914_v19, %v931_v48 }
  0x99   :  { %v566_v25 = vsel %vm559_vm10, %v562_v52, %v565_v29  ;;  %v643_v22 = vor.u32 %v642_v27, %v641_v58  ;;  %v646_v55 = vshll.u32 %v645_v1, 23  ;;  %v776_v12 = vsel %vm769_vm11, %v772_v7, %v775_v41 }
  0x9a   :  { %v567_v2 = vsel %vm556_vm12, nan, %v566_v25  ;;  %v777_v10 = vsel %vm556_vm12, nan, %v776_v12  ;;  %v933_v16 = vsel %vm919_vm14, %v930_v23, %v932_v20  ;;  %vm1001_vm2 = vcmp.gt.s32.totalorder %v1000_v38, 0 }
  0x9b   :  { %673 = vst [vmem:[#allocation5 + $0x10] sm:$0xff] %v567_v2  ;;  %v647_v5 = vor.u32 4788187, %v646_v55  ;;  %v650_v50 = vcvt.s32.f32 %v643_v22  ;;  %882 = vst [vmem:[#allocation5 + $0x70] sm:$0xff] %v777_v10  ;;  %v3341_v37 = vmul.u32.u64.low %v3287_v33, %v929_v4  ;;  %v3342_v28 = vmul.u32.u64.high %v3287_v33, %v929_v4, %v3341_v37 }
  0x9c   :  { %v3346_v26 = vmul.u32.u64.low %v3287_v33, %v933_v16  ;;  %v3347_v57 = vmul.u32.u64.high %v3287_v33, %v933_v16, %v3346_v26  ;;  %v1002_v43 = vsel %vm1001_vm2, %v1000_v38, 0  ;;  %v998_v46 = vor.u32 8388608, %v3274_v24 }
  0x9d   :  { %v648_v54 = vand.u32 2147483647, %v647_v5  ;;  %v1004_v56 = vand.u32 31, %v1002_v43  ;;  %v661_v19 = vadd.s32 3, %v3285_v32  ;;  %v941_v17 = vmul.u32 %v3287_v33, %v925_v34 }
  0x9e   :  { %v3353_v30 = vmul.f32 26.808258, %v2878_v11  ;;  %v944_v39 = vadd.s32 1, %v3342_v28  ;;  %vm943_vm3 = vc.u32 %v3347_v57, %v3341_v37  ;;  %v1003_v24 = vshrl.u32 %v1002_v43, 5 }
  0x9f   :  { %v651_v40 = vmul.f32 %v650_v50, %v648_v54  ;;  %v1005_v31 = vsub.s32 32, %v1004_v56  ;;  %v1007_v0 = vshll.u32 %v2846_v45, %v1004_v56  ;;  %v1010_v59 = vshll.u32 %v2847_v47, %v1004_v56 }
  0xa0   :  { %v1013_v38 = vshll.u32 %v2848_v49, %v1004_v56  ;;  %v945_v9 = vsel %vm943_vm3, %v944_v39, %v3342_v28  ;;  %v1016_v3 = vshll.u32 %v2849_v51, %v1004_v56  ;;  %v1019_v7 = vshll.u32 %v2850_v53, %v1004_v56 }
  0xa1   :  { %v652_v60 = vxor.u32 2147483648, %v651_v40  ;;  %v1006_v33 = vshrl.u32 %v2846_v45, %v1005_v31  ;;  %v1008_v18 = vshrl.u32 %v2847_v47, %v1005_v31  ;;  %v1011_v58 = vshrl.u32 %v2848_v49, %v1005_v31 }
  0xa2   :  { %v946_v15 = vadd.s32 %v945_v9, %v941_v17  ;;  %v1014_v63 = vshrl.u32 %v2849_v51, %v1005_v31  ;;  %v1017_v1 = vshrl.u32 %v2850_v53, %v1005_v31  ;;  %v1020_v23 = vshrl.u32 %v2851_v61, %v1005_v31 }
  0xa3   :  { %v653_v62 = vsel %vm570_vm6, %v652_v60, %v651_v40  ;;  %v1009_v29 = vor.u32 %v1008_v18, %v1007_v0  ;;  %v1012_v27 = vor.u32 %v1011_v58, %v1010_v59  ;;  %vm1022_vm6 = vcmp.lt.s32.totalorder %v1003_v24, 1 }
  0xa4   :  { %v656_v8 = vsel %vm3254_vm5, %v2901_v35, %v653_v62  ;;  %v947_v41 = vadd.s32 536870912, %v946_v15  ;;  %v1015_v52 = vor.u32 %v1014_v63, %v1013_v38  ;;  %v1018_v44 = vor.u32 %v1017_v1, %v1016_v3 }
  0xa5   :  { %2759 = vcosq.f32 %v656_v8  ;;  %vm1024_vm7 = vcmp.lt.s32.totalorder %v1003_v24, 3  ;;  %vm1025_vm8 = vcmp.lt.s32.totalorder %v1003_v24, 4  ;;  %v1038_v22 = vshll.u32 %v998_v46, 8 }
  0xa6   :  { %2761 = vsinq.f32 %v656_v8  ;;  %v948_v25 = vshrl.u32 %v947_v41, 30  ;;  %v1021_v21 = vor.u32 %v1020_v23, %v1019_v7  ;;  %vm1023_vm5 = vcmp.lt.s32.totalorder %v1003_v24, 2 }
  0xa7   :  { %v1027_v55 = vsel %vm1025_vm8, %v1015_v52, 2102212464  ;;  %v1030_v12 = vsel %vm1022_vm6, %v1009_v29, %v1012_v27  ;;  %v662_v2 = vand.u32 3, %v661_v19  ;;  %v871_v10 = vand.u32 3, %v3285_v32 }
  0xa8   :  { %v949_v4 = vshll.u32 %v948_v25, 30  ;;  %v1031_v48 = vsel %vm1025_vm8, %v1018_v44, 920167782  ;;  %vm660_vm4 = vweird.f32 %v2901_v35  ;;  %v1026_v5 = vsel %vm1022_vm6, %v1006_v33, %v1009_v29 }
  0xa9   :  { %v1032_v50 = vsel %vm1024_vm7, %v1015_v52, %v1031_v48  ;;  %v1034_v34 = vsel %vm1022_vm6, %v1012_v27, %v1015_v52  ;;  %v1035_v20 = vsel %vm1025_vm8, %v1021_v21, 1326507024  ;;  %v1028_v28 = vsel %vm1024_vm7, %v1012_v27, %v1027_v55 }
  0xaa   :  { %v3381_v16 = vsub.s32 %v946_v15, %v949_v4  ;;  %v1033_v54 = vsel %vm1023_vm5, %v1030_v12, %v1032_v50  ;;  %v1036_v26 = vsel %vm1024_vm7, %v1018_v44, %v1035_v20  ;;  %vm888_vm9 = vcmp.lt.s32.totalorder %v2991_v42, 0 }
  0xab   :  { %v1037_v32 = vsel %vm1023_vm5, %v1034_v34, %v1036_v26  ;;  %v3388_v43 = vmul.u32.u64.low %v1038_v22, %v1033_v54  ;;  %v3389_v46 = vmul.u32.u64.high %v1038_v22, %v1033_v54, %v3388_v43  ;;  %vm3394_vm10 = vcmp.le.f32.partialorder %v886_v6, 0.7853982 }
  0xac   :  { %v952_v40 = vsub.s32 0, %v3381_v16  ;;  %v3399_v19 = vmul.u32.u64.low %v1038_v22, %v1037_v32  ;;  %v3400_v17 = vmul.u32.u64.high %v1038_v22, %v1037_v32, %v3399_v19  ;;  %v1308_v39 = vand.u32 2147483647, %v3353_v30 }
  0xad   :  { %vm872_vm11 = vcmp.lt.s32.totalorder %v871_v10, 2  ;;  %v972_v31 = vsub.s32 4, %v948_v25  ;;  %v1029_v0 = vsel %vm1023_vm5, %v1026_v5, %v1028_v28  ;;  %v1311_v59 = vand.u32 2139095040, %v3353_v30 }
  0xae   :  { %vm667_vm12 = vcmp.eq.s32.totalorder %v662_v2, 2  ;;  %vm873_vm13 = vcmp.eq.s32.totalorder %v871_v10, 0  ;;  %vm876_vm14 = vcmp.eq.s32.totalorder %v871_v10, 2  ;;  %v2622_v6 = vmin.u32 %v952_v40, %v3381_v16 }
  0xaf   :  { %v2760_v60 = vpop.eup %2759  ;;  %vm663_vm15 = vcmp.lt.s32.totalorder %v662_v2, 2  ;;  %vm664_vm0 = vcmp.eq.s32.totalorder %v662_v2, 0  ;;  %v1048_v33 = vadd.s32 1, %v3389_v46  ;;  %v942_v58 = vadd.s32 %v3341_v37, %v3347_v57 }
  0xb0   :  { %v2762_v38 = vpop.eup %2761  ;;  %v668_v9 = vxor.u32 2147483648, %v2760_v60  ;;  %v954_v24 = vclz %v2622_v6  ;;  %v1045_v62 = vmul.u32 %v1038_v22, %v1029_v0  ;;  %v973_v3 = vsel %vm888_vm9, %v972_v31, %v948_v25 }
  0xb1   :  { %v665_v18 = vxor.u32 2147483648, %v2762_v38  ;;  %v1312_v8 = vshrl.u32 %v1311_v59, 23  ;;  %vm1047_vm1 = vc.u32 %v3400_v17, %v3388_v43  ;;  %v3418_v57 = vmul.f32 26.808258, %v2883_v14 }
  0xb2   :  { %v669_v15 = vsel %vm667_vm12, %v668_v9, %v2762_v38  ;;  %v878_v63 = vsel %vm876_vm14, %v668_v9, %v2762_v38  ;;  %v2623_v1 = vadd.s32 4294967294, %v954_v24  ;;  %v1049_v37 = vsel %vm1047_vm1, %v1048_v33, %v3389_v46 }
  0xb3   :  { %v666_v29 = vsel %vm664_vm0, %v2760_v60, %v665_v18  ;;  %v875_v27 = vsel %vm873_vm13, %v2760_v60, %v665_v18  ;;  %v1050_v23 = vadd.s32 %v1049_v37, %v1045_v62  ;;  %v975_v22 = vsel %vm3394_vm10, 0, %v973_v3 }
  0xb4   :  { %v670_v41 = vsel %vm663_vm15, %v666_v29, %v669_v15  ;;  %v879_v52 = vsel %vm872_vm11, %v875_v27, %v878_v63  ;;  %vm2624_vm2 = vcmp.lt.s32.totalorder %v2623_v1, 0  ;;  %v2637_v21 = vadd.s32 4294967169, %v1312_v8 }
  0xb5   :  { %v671_v7 = vsel %vm660_vm4, nan, %v670_v41  ;;  %v880_v44 = vsel %vm660_vm4, nan, %v879_v52  ;;  %v957_v25 = vsel %vm2624_vm2, 0, %v2623_v1  ;;  %v1051_v10 = vadd.s32 536870912, %v1050_v23 }
  0xb6   :  { %674 = vst [vmem:[#allocation5 + $0x18] sm:$0xff] %v671_v7  ;;  %883 = vst [vmem:[#allocation5 + $0x78] sm:$0xff] %v880_v44  ;;  %v958_v55 = vsub.s32 32, %v957_v25  ;;  %v959_v12 = vshll.u32 %v3381_v16, %v957_v25  ;;  %v962_v2 = vsub.s32 4294967266, %v957_v25  ;;  %v1315_v4 = vand.u32 8388607, %v1308_v39 }
  0xb7   :  { %v1318_v48 = vadd.s32 1, %v2637_v21  ;;  %v1415_v35 = vand.u32 2139095040, %v3418_v57  ;;  %v3430_v34 = vshrl.u32 %v1051_v10, 30  ;;  %v979_v20 = vadd.s32 3, %v975_v22 }
  0xb8   :  { %v960_v5 = vshrl.u32 %v942_v58, %v958_v55  ;;  %v963_v50 = vadd.s32 127, %v962_v2  ;;  %v1316_v16 = vor.u32 8388608, %v1315_v4  ;;  %v1412_v0 = vand.u32 2147483647, %v3418_v57 }
  0xb9   :  { %vm1319_vm3 = vcmp.gt.s32.totalorder %v1318_v48, 0  ;;  %v1053_v26 = vshll.u32 %v3430_v34, 30  ;;  %v1416_v32 = vshrl.u32 %v1415_v35, 23  ;;  %v3436_v59 = vand.u32 3, %v975_v22 }
  0xba   :  { %v961_v28 = vor.u32 %v960_v5, %v959_v12  ;;  %v964_v54 = vshll.u32 %v963_v50, 23  ;;  %v1320_v46 = vsel %vm1319_vm3, %v1318_v48, 0  ;;  %v3438_v38 = vand.u32 3, %v979_v20 }
  0xbb   :  { %v3433_v31 = vsub.s32 %v1050_v23, %v1053_v26  ;;  %v1322_v60 = vand.u32 31, %v1320_v46  ;;  %v2641_v33 = vadd.s32 4294967169, %v1416_v32  ;;  %v1046_v18 = vadd.s32 %v3388_v43, %v3400_v17 }
  0xbc   :  { %v965_v40 = vor.u32 4788187, %v964_v54  ;;  %v968_v19 = vcvt.s32.f32 %v961_v28  ;;  %v3445_v62 = vmul.f32 107.23303, %v2878_v11  ;;  %v3448_v3 = vshll.u32 %v1316_v16, 8 }
  0xbd   :  { %v1056_v9 = vsub.s32 0, %v3433_v31  ;;  %v1323_v58 = vsub.s32 32, %v1322_v60  ;;  %v1325_v24 = vshll.u32 %v2846_v45, %v1322_v60  ;;  %v3452_v8 = vand.u32 8388607, %v1412_v0 }
  0xbe   :  { %v966_v6 = vand.u32 2147483647, %v965_v40  ;;  %v1076_v29 = vsub.s32 4, %v3430_v34  ;;  %v1328_v43 = vshll.u32 %v2847_v47, %v1322_v60  ;;  %v1331_v17 = vshll.u32 %v2848_v49, %v1322_v60 }
  0xbf   :  { %v2626_v63 = vmin.u32 %v1056_v9, %v3433_v31  ;;  %v1326_v27 = vshrl.u32 %v2847_v47, %v1323_v58  ;;  %v1321_v52 = vshrl.u32 %v1320_v46, 5  ;;  %v1422_v37 = vadd.s32 1, %v2641_v33 }
  0xc0   :  { %v969_v15 = vmul.f32 %v968_v19, %v966_v6  ;;  %vm992_vm6 = vcmp.lt.s32.totalorder %v3000_v36, 0  ;;  %v1324_v7 = vshrl.u32 %v2846_v45, %v1323_v58  ;;  %v1329_v23 = vshrl.u32 %v2848_v49, %v1323_v58 }
  0xc1   :  { %v1058_v41 = vclz %v2626_v63  ;;  %v1327_v44 = vor.u32 %v1326_v27, %v1325_v24  ;;  %v1332_v25 = vshrl.u32 %v2849_v51, %v1323_v58  ;;  %v1334_v55 = vshll.u32 %v2849_v51, %v1322_v60 }
  0xc2   :  { %v970_v1 = vxor.u32 2147483648, %v969_v15  ;;  %v1335_v12 = vshrl.u32 %v2850_v53, %v1323_v58  ;;  %v1330_v10 = vor.u32 %v1329_v23, %v1328_v43  ;;  %v1337_v48 = vshll.u32 %v2850_v53, %v1322_v60 }
  0xc3   :  { %v2627_v21 = vadd.s32 4294967294, %v1058_v41  ;;  %v1333_v4 = vor.u32 %v1332_v25, %v1331_v17  ;;  %vm3472_vm7 = vcmp.le.f32.partialorder %v990_v13, 0.7853982  ;;  %v1338_v50 = vshrl.u32 %v2851_v61, %v1323_v58 }
  0xc4   :  { %v971_v22 = vsel %vm888_vm9, %v970_v1, %v969_v15  ;;  %v1336_v5 = vor.u32 %v1335_v12, %v1334_v55  ;;  %vm1340_vm5 = vcmp.lt.s32.totalorder %v1321_v52, 1  ;;  %vm1341_vm4 = vcmp.lt.s32.totalorder %v1321_v52, 2 }
  0xc5   :  { %v974_v2 = vsel %vm3394_vm10, %v2991_v42, %v971_v22  ;;  %vm2628_vm8 = vcmp.lt.s32.totalorder %v2627_v21, 0  ;;  %v1339_v26 = vor.u32 %v1338_v50, %v1337_v48  ;;  %vm982_vm9 = vcmp.eq.s32.totalorder %v3438_v38, 0 }
  0xc6   :  { %2763 = vcosq.f32 %v974_v2  ;;  %v1061_v20 = vsel %vm2628_vm8, 0, %v2627_v21  ;;  %vm1192_vm10 = vcmp.eq.s32.totalorder %v3436_v59, 0  ;;  %vm1342_vm11 = vcmp.lt.s32.totalorder %v1321_v52, 3 }
  0xc7   :  { %2765 = vsinq.f32 %v974_v2  ;;  %v1062_v56 = vsub.s32 32, %v1061_v20  ;;  %v1063_v28 = vshll.u32 %v3433_v31, %v1061_v20  ;;  %v1066_v54 = vsub.s32 4294967266, %v1061_v20 }
  0xc8   :  { %vm1343_vm12 = vcmp.lt.s32.totalorder %v1321_v52, 4  ;;  %v1344_v13 = vsel %vm1340_vm5, %v1324_v7, %v1327_v44  ;;  %v1348_v32 = vsel %vm1340_vm5, %v1327_v44, %v1330_v10  ;;  %vm981_vm13 = vcmp.lt.s32.totalorder %v3438_v38, 2 }
  0xc9   :  { %v1064_v16 = vshrl.u32 %v1046_v18, %v1062_v56  ;;  %v1067_v46 = vadd.s32 127, %v1066_v54  ;;  %vm1191_vm14 = vcmp.lt.s32.totalorder %v3436_v59, 2  ;;  %v1345_v40 = vsel %vm1343_vm12, %v1333_v4, 2102212464 }
  0xca   :  { %v1349_v19 = vsel %vm1343_vm12, %v1336_v5, 920167782  ;;  %vm978_vm15 = vweird.f32 %v2991_v42  ;;  %v1346_v31 = vsel %vm1342_vm11, %v1330_v10, %v1345_v40  ;;  %v1352_v6 = vsel %vm1340_vm5, %v1330_v10, %v1333_v4 }
  0xcb   :  { %v1350_v60 = vsel %vm1342_vm11, %v1333_v4, %v1349_v19  ;;  %v1353_v9 = vsel %vm1343_vm12, %v1339_v26, 1326507024  ;;  %v1065_v33 = vor.u32 %v1064_v16, %v1063_v28  ;;  %v1068_v58 = vshll.u32 %v1067_v46, 23 }
  0xcc   :  { %v1077_v18 = vsel %vm992_vm6, %v1076_v29, %v3430_v34  ;;  %v1351_v24 = vsel %vm1341_vm4, %v1348_v32, %v1350_v60  ;;  %v1347_v15 = vsel %vm1341_vm4, %v1344_v13, %v1346_v31  ;;  %v1354_v63 = vsel %vm1342_vm11, %v1336_v5, %v1353_v9 }
  0xcd   :  { %v3495_v27 = vmul.u32.u64.low %v3448_v3, %v1351_v24  ;;  %v3496_v43 = vmul.u32.u64.high %v3448_v3, %v1351_v24, %v3495_v27  ;;  %v1069_v17 = vor.u32 4788187, %v1068_v58  ;;  %v1072_v1 = vcvt.s32.f32 %v1065_v33 }
  0xce   :  { %v1355_v41 = vsel %vm1341_vm4, %v1352_v6, %v1354_v63  ;;  %vm1423_vm0 = vcmp.gt.s32.totalorder %v1422_v37, 0  ;;  %v1079_v7 = vsel %vm3472_vm7, 0, %v1077_v18  ;;  %vm985_vm1 = vcmp.eq.s32.totalorder %v3438_v38, 2 }
  0xcf   :  { %v3503_v34 = vmul.u32.u64.low %v3448_v3, %v1355_v41  ;;  %v3504_v29 = vmul.u32.u64.high %v3448_v3, %v1355_v41, %v3503_v34  ;;  %v1424_v44 = vsel %vm1423_vm0, %v1422_v37, 0  ;;  %v1070_v25 = vand.u32 2147483647, %v1069_v17 }
  0xd0   :  { %v2764_v23 = vpop.eup %2763  ;;  %vm1195_vm2 = vcmp.eq.s32.totalorder %v3436_v59, 2  ;;  %v1426_v22 = vand.u32 31, %v1424_v44  ;;  %v1363_v52 = vmul.u32 %v3448_v3, %v1347_v15  ;;  %v1366_v12 = vadd.s32 1, %v3496_v43 }
  0xd1   :  { %v2766_v21 = vpop.eup %2765  ;;  %v986_v55 = vxor.u32 2147483648, %v2764_v23  ;;  %v1420_v2 = vor.u32 8388608, %v3452_v8  ;;  %v1073_v4 = vmul.f32 %v1072_v1, %v1070_v25  ;;  %v1083_v48 = vadd.s32 3, %v1079_v7 }
  0xd2   :  { %v983_v10 = vxor.u32 2147483648, %v2766_v21  ;;  %v1427_v5 = vsub.s32 32, %v1426_v22  ;;  %vm1365_vm3 = vc.u32 %v3504_v29, %v3495_v27  ;;  %v3513_v20 = vshrl.u32 %v1424_v44, 5 }
  0xd3   :  { %v987_v37 = vsel %vm985_vm1, %v986_v55, %v2766_v21  ;;  %v1197_v50 = vsel %vm1195_vm2, %v986_v55, %v2766_v21  ;;  %v1074_v28 = vxor.u32 2147483648, %v1073_v4  ;;  %v1367_v8 = vsel %vm1365_vm3, %v1366_v12, %v3496_v43 }
  0xd4   :  { %v984_v56 = vsel %vm982_vm9, %v2764_v23, %v983_v10  ;;  %v1194_v3 = vsel %vm1192_vm10, %v2764_v23, %v983_v10  ;;  %v1368_v13 = vadd.s32 %v1367_v8, %v1363_v52  ;;  %v1429_v32 = vshll.u32 %v2846_v45, %v1426_v22 }
  0xd5   :  { %v988_v54 = vsel %vm981_vm13, %v984_v56, %v987_v37  ;;  %v1198_v26 = vsel %vm1191_vm14, %v1194_v3, %v1197_v50  ;;  %v1075_v46 = vsel %vm992_vm6, %v1074_v28, %v1073_v4  ;;  %v1430_v19 = vshrl.u32 %v2847_v47, %v1427_v5 }
  0xd6   :  { %v989_v16 = vsel %vm978_vm15, nan, %v988_v54  ;;  %v1199_v40 = vsel %vm978_vm15, nan, %v1198_v26  ;;  %v1078_v59 = vsel %vm3472_vm7, %v3000_v36, %v1075_v46  ;;  %v1369_v38 = vadd.s32 536870912, %v1368_v13 }
  0xd7   :  { %1095 = vst [vmem:[#allocation5 + $0x20] sm:$0xff] %v989_v16  ;;  %1304 = vst [vmem:[#allocation5 + $0x80] sm:$0xff] %v1199_v40  ;;  %v1432_v31 = vshll.u32 %v2847_v47, %v1426_v22  ;;  %v1433_v60 = vshrl.u32 %v2848_v49, %v1427_v5  ;;  %2767 = vcosq.f32 %v1078_v59  ;;  %v3537_v6 = vand.u32 3, %v1079_v7 }
  0xd8   :  { %v1435_v9 = vshll.u32 %v2848_v49, %v1426_v22  ;;  %v1436_v42 = vshrl.u32 %v2849_v51, %v1427_v5  ;;  %2769 = vsinq.f32 %v1078_v59  ;;  %v3541_v33 = vshrl.u32 %v1369_v38, 30 }
  0xd9   :  { %v1431_v58 = vor.u32 %v1430_v19, %v1429_v32  ;;  %v1438_v35 = vshll.u32 %v2849_v51, %v1426_v22  ;;  %v1434_v18 = vor.u32 %v1433_v60, %v1432_v31  ;;  %v1439_v24 = vshrl.u32 %v2850_v53, %v1427_v5 }
  0xda   :  { %v1441_v15 = vshll.u32 %v2850_v53, %v1426_v22  ;;  %v1442_v63 = vshrl.u32 %v2851_v61, %v1427_v5  ;;  %v1084_v43 = vand.u32 3, %v1083_v48  ;;  %v1371_v17 = vshll.u32 %v3541_v33, 30 }
  0xdb   :  { %v1437_v1 = vor.u32 %v1436_v42, %v1435_v9  ;;  %vm1444_vm6 = vcmp.lt.s32.totalorder %v3513_v20, 1  ;;  %vm1294_vm7 = vcmp.lt.s32.totalorder %v3537_v6, 2  ;;  %v1440_v41 = vor.u32 %v1439_v24, %v1438_v35 }
  0xdc   :  { %v1443_v7 = vor.u32 %v1442_v63, %v1441_v15  ;;  %vm1446_vm8 = vcmp.lt.s32.totalorder %v3513_v20, 3  ;;  %vm1447_vm5 = vcmp.lt.s32.totalorder %v3513_v20, 4  ;;  %vm1082_vm4 = vweird.f32 %v3000_v36 }
  0xdd   :  { %vm1295_vm9 = vcmp.eq.s32.totalorder %v3537_v6, 0  ;;  %v3554_v34 = vsub.s32 %v1368_v13, %v1371_v17  ;;  %v1428_v44 = vshrl.u32 %v2846_v45, %v1427_v5  ;;  %vm1445_vm10 = vcmp.lt.s32.totalorder %v3513_v20, 2 }
  0xde   :  { %v1449_v23 = vsel %vm1447_vm5, %v1437_v1, 2102212464  ;;  %v1452_v25 = vsel %vm1444_vm6, %v1431_v58, %v1434_v18  ;;  %v1453_v22 = vsel %vm1447_vm5, %v1440_v41, 920167782  ;;  %v1460_v21 = vshll.u32 %v1420_v2, 8 }
  0xdf   :  { %vm1085_vm11 = vcmp.lt.s32.totalorder %v1084_v43, 2  ;;  %vm1298_vm12 = vcmp.eq.s32.totalorder %v3537_v6, 2  ;;  %vm1310_vm13 = vcmp.lt.s32.totalorder %v3353_v30, 0  ;;  %v1374_v55 = vsub.s32 0, %v3554_v34 }
  0xe0   :  { %v1454_v52 = vsel %vm1446_vm8, %v1437_v1, %v1453_v22  ;;  %vm1089_vm14 = vcmp.eq.s32.totalorder %v1084_v43, 2  ;;  %v1456_v10 = vsel %vm1444_vm6, %v1434_v18, %v1437_v1  ;;  %v1457_v2 = vsel %vm1447_vm5, %v1443_v7, 1326507024 }
  0xe1   :  { %v1455_v12 = vsel %vm1445_vm10, %v1452_v25, %v1454_v52  ;;  %v2638_v4 = vmin.u32 %v1374_v55, %v3554_v34  ;;  %v1448_v48 = vsel %vm1444_vm6, %v1428_v44, %v1431_v58  ;;  %v1450_v5 = vsel %vm1446_vm8, %v1434_v18, %v1449_v23  ;;  %v2768_v50 = vpop.eup %2767 }
  0xe2   :  { %v1458_v37 = vsel %vm1446_vm8, %v1440_v41, %v1457_v2  ;;  %v3584_v28 = vmul.u32.u64.low %v1460_v21, %v1455_v12  ;;  %v3585_v3 = vmul.u32.u64.high %v1460_v21, %v1455_v12, %v3584_v28  ;;  %v1733_v8 = vand.u32 2139095040, %v3445_v62  ;;  %v2770_v54 = vpop.eup %2769 }
  0xe3   :  { %v1459_v56 = vsel %vm1445_vm10, %v1456_v10, %v1458_v37  ;;  %vm1086_vm15 = vcmp.eq.s32.totalorder %v1084_v43, 0  ;;  %v1090_v26 = vxor.u32 2147483648, %v2768_v50  ;;  %v1376_v13 = vclz %v2638_v4 }
  0xe4   :  { %v1394_v32 = vsub.s32 4, %v3541_v33  ;;  %v1087_v16 = vxor.u32 2147483648, %v2770_v54  ;;  %v1451_v46 = vsel %vm1445_vm10, %v1448_v48, %v1450_v5  ;;  %v1364_v31 = vadd.s32 %v3495_v27, %v3504_v29 }
  0xe5   :  { %v3592_v40 = vmul.u32.u64.low %v1460_v21, %v1459_v56  ;;  %v3593_v19 = vmul.u32.u64.high %v1460_v21, %v1459_v56, %v3592_v40  ;;  %v1091_v59 = vsel %vm1089_vm14, %v1090_v26, %v2770_v54  ;;  %v1300_v38 = vsel %vm1298_vm12, %v1090_v26, %v2770_v54 }
  0xe6   :  { %v2639_v60 = vadd.s32 4294967294, %v1376_v13  ;;  %v1088_v9 = vsel %vm1086_vm15, %v2768_v50, %v1087_v16  ;;  %v1297_v42 = vsel %vm1295_vm9, %v2768_v50, %v1087_v16  ;;  %v1470_v58 = vadd.s32 1, %v3585_v3 }
  0xe7   :  { %v1734_v20 = vshrl.u32 %v1733_v8, 23  ;;  %v1092_v35 = vsel %vm1085_vm11, %v1088_v9, %v1091_v59  ;;  %v1301_v18 = vsel %vm1294_vm7, %v1297_v42, %v1300_v38  ;;  %v1467_v24 = vmul.u32 %v1460_v21, %v1451_v46 }
  0xe8   :  { %vm2640_vm0 = vcmp.lt.s32.totalorder %v2639_v60, 0  ;;  %v1093_v15 = vsel %vm1082_vm4, nan, %v1092_v35  ;;  %v1302_v27 = vsel %vm1082_vm4, nan, %v1301_v18  ;;  %v1395_v63 = vsel %vm1310_vm13, %v1394_v32, %v3541_v33 }
  0xe9   :  { %v1379_v29 = vsel %vm2640_vm0, 0, %v2639_v60  ;;  %1096 = vst [vmem:[#allocation5 + $0x28] sm:$0xff] %v1093_v15  ;;  %1305 = vst [vmem:[#allocation5 + $0x88] sm:$0xff] %v1302_v27  ;;  %vm1469_vm1 = vc.u32 %v3593_v19, %v3584_v28  ;;  %vm3618_vm2 = vcmp.le.f32.partialorder %v1308_v39, 0.7853982  ;;  %v2653_v33 = vadd.s32 4294967169, %v1734_v20 }
  0xea   :  { %v1380_v43 = vsub.s32 32, %v1379_v29  ;;  %v1381_v17 = vshll.u32 %v3554_v34, %v1379_v29  ;;  %v1384_v6 = vsub.s32 4294967266, %v1379_v29  ;;  %v1471_v36 = vsel %vm1469_vm1, %v1470_v58, %v3585_v3 }
  0xeb   :  { %v1730_v41 = vand.u32 2147483647, %v3445_v62  ;;  %v1397_v34 = vsel %vm3618_vm2, 0, %v1395_v63  ;;  %v1472_v23 = vadd.s32 %v1471_v36, %v1467_v24  ;;  %v1740_v25 = vadd.s32 1, %v2653_v33 }
  0xec   :  { %v1382_v7 = vshrl.u32 %v1364_v31, %v1380_v43  ;;  %v1385_v44 = vadd.s32 127, %v1384_v6  ;;  %v1401_v52 = vadd.s32 3, %v1397_v34  ;;  %v3636_v26 = vmul.f32 107.23303, %v2883_v14 }
  0xed   :  { %v1473_v55 = vadd.s32 536870912, %v1472_v23  ;;  %v1737_v39 = vand.u32 8388607, %v1730_v41  ;;  %vm1741_vm3 = vcmp.gt.s32.totalorder %v1740_v25, 0  ;;  %v1468_v59 = vadd.s32 %v3584_v28, %v3593_v19 }
  0xee   :  { %v1383_v22 = vor.u32 %v1382_v7, %v1381_v17  ;;  %v1386_v21 = vshll.u32 %v1385_v44, 23  ;;  %v1742_v4 = vsel %vm1741_vm3, %v1740_v25, 0  ;;  %v3631_v50 = vand.u32 3, %v1401_v52 }
  0xef   :  { %v3628_v2 = vshrl.u32 %v1473_v55, 30  ;;  %v1744_v48 = vand.u32 31, %v1742_v4  ;;  %v1738_v54 = vor.u32 8388608, %v1737_v39  ;;  %v3645_v31 = vand.u32 3, %v1397_v34 }
  0xf0   :  { %v1387_v12 = vor.u32 4788187, %v1386_v21  ;;  %v1390_v10 = vcvt.s32.f32 %v1383_v22  ;;  %v1743_v18 = vshrl.u32 %v1742_v4, 5  ;;  %v1837_v28 = vand.u32 2139095040, %v3636_v26 }
  0xf1   :  { %v1475_v37 = vshll.u32 %v3628_v2, 30  ;;  %v1745_v56 = vsub.s32 32, %v1744_v48  ;;  %v1747_v13 = vshll.u32 %v2846_v45, %v1744_v48  ;;  %v1750_v16 = vshll.u32 %v2847_v47, %v1744_v48 }
  0xf2   :  { %v1388_v5 = vand.u32 2147483647, %v1387_v12  ;;  %v1753_v60 = vshll.u32 %v2848_v49, %v1744_v48  ;;  %v1756_v42 = vshll.u32 %v2849_v51, %v1744_v48  ;;  %v3658_v27 = vshll.u32 %v1738_v54, 8 }
  0xf3   :  { %v3633_v8 = vsub.s32 %v1472_v23, %v1475_v37  ;;  %v1748_v32 = vshrl.u32 %v2847_v47, %v1745_v56  ;;  %v1751_v46 = vshrl.u32 %v2848_v49, %v1745_v56  ;;  %v1754_v9 = vshrl.u32 %v2849_v51, %v1745_v56 }
  0xf4   :  { %v1391_v3 = vmul.f32 %v1390_v10, %v1388_v5  ;;  %v1757_v58 = vshrl.u32 %v2850_v53, %v1745_v56  ;;  %v1746_v63 = vshrl.u32 %v2846_v45, %v1745_v56  ;;  %v1834_v43 = vand.u32 2147483647, %v3636_v26 }
  0xf5   :  { %v1478_v38 = vsub.s32 0, %v3633_v8  ;;  %v1749_v24 = vor.u32 %v1748_v32, %v1747_v13  ;;  %v1752_v15 = vor.u32 %v1751_v46, %v1750_v16  ;;  %v1755_v17 = vor.u32 %v1754_v9, %v1753_v60 }
  0xf6   :  { %v1392_v40 = vxor.u32 2147483648, %v1391_v3  ;;  %v1758_v6 = vor.u32 %v1757_v58, %v1756_v42  ;;  %v1759_v36 = vshll.u32 %v2850_v53, %v1744_v48  ;;  %vm1407_vm6 = vcmp.eq.s32.totalorder %v3631_v50, 2 }
  0xf7   :  { %v2642_v35 = vmin.u32 %v1478_v38, %v3633_v8  ;;  %vm1414_vm7 = vcmp.lt.s32.totalorder %v3418_v57, 0  ;;  %vm1617_vm8 = vcmp.eq.s32.totalorder %v3645_v31, 2  ;;  %v1760_v33 = vshrl.u32 %v2851_v61, %v1745_v56 }
  0xf8   :  { %v1393_v20 = vsel %vm1310_vm13, %v1392_v40, %v1391_v3  ;;  %vm1762_vm5 = vcmp.lt.s32.totalorder %v1743_v18, 1  ;;  %v1838_v7 = vshrl.u32 %v1837_v28, 23  ;;  %vm1404_vm4 = vcmp.eq.s32.totalorder %v3631_v50, 0 }
  0xf9   :  { %v1396_v19 = vsel %vm3618_vm2, %v3353_v30, %v1393_v20  ;;  %v1480_v29 = vclz %v2642_v35  ;;  %vm1614_vm9 = vcmp.eq.s32.totalorder %v3645_v31, 0  ;;  %vm1763_vm10 = vcmp.lt.s32.totalorder %v1743_v18, 2 }
  0xfa   :  { %2771 = vcosq.f32 %v1396_v19  ;;  %vm1764_vm11 = vcmp.lt.s32.totalorder %v1743_v18, 3  ;;  %vm1765_vm12 = vcmp.lt.s32.totalorder %v1743_v18, 4  ;;  %v1770_v44 = vsel %vm1762_vm5, %v1749_v24, %v1752_v15 }
  0xfb   :  { %2773 = vsinq.f32 %v1396_v19  ;;  %v2643_v1 = vadd.s32 4294967294, %v1480_v29  ;;  %vm1403_vm13 = vcmp.lt.s32.totalorder %v3631_v50, 2  ;;  %vm1613_vm15 = vcmp.lt.s32.totalorder %v3645_v31, 2 }
  0xfc   :  { %v1761_v34 = vor.u32 %v1760_v33, %v1759_v36  ;;  %v1767_v23 = vsel %vm1765_vm12, %v1755_v17, 2102212464  ;;  %v1771_v25 = vsel %vm1765_vm12, %v1758_v6, 920167782  ;;  %vm1400_vm0 = vweird.f32 %v3353_v30 }
  0xfd   :  { %vm2644_vm14 = vcmp.lt.s32.totalorder %v2643_v1, 0  ;;  %vm3677_vm1 = vcmp.le.f32.partialorder %v1412_v0, 0.7853982  ;;  %v1766_v55 = vsel %vm1762_vm5, %v1746_v63, %v1749_v24  ;;  %v1768_v52 = vsel %vm1764_vm11, %v1752_v15, %v1767_v23 }
  0xfe   :  { %v1483_v21 = vsel %vm2644_vm14, 0, %v2643_v1  ;;  %v1772_v39 = vsel %vm1764_vm11, %v1755_v17, %v1771_v25  ;;  %v1774_v48 = vsel %vm1762_vm5, %v1752_v15, %v1755_v17  ;;  %v1498_v5 = vsub.s32 4, %v3628_v2 }
  0xff   :  { %v1484_v12 = vsub.s32 32, %v1483_v21  ;;  %v1485_v10 = vshll.u32 %v3633_v8, %v1483_v21  ;;  %v1488_v4 = vsub.s32 4294967266, %v1483_v21  ;;  %v1773_v0 = vsel %vm1763_vm10, %v1770_v44, %v1772_v39 }
 0x100   :  { %v1775_v37 = vsel %vm1765_vm12, %v1761_v34, 1326507024  ;;  %v2657_v56 = vadd.s32 4294967169, %v1838_v7  ;;  %v1769_v13 = vsel %vm1763_vm10, %v1766_v55, %v1768_v52  ;;  %v1499_v35 = vsel %vm1414_vm7, %v1498_v5, %v3628_v2 }
 0x101   :  { %v1486_v3 = vshrl.u32 %v1468_v59, %v1484_v12  ;;  %v1489_v54 = vadd.s32 127, %v1488_v4  ;;  %v1776_v32 = vsel %vm1764_vm11, %v1758_v6, %v1775_v37  ;;  %v3706_v18 = vand.u32 8388607, %v1834_v43 }
 0x102   :  { %v1777_v16 = vsel %vm1763_vm10, %v1774_v48, %v1776_v32  ;;  %v3693_v8 = vmul.u32.u64.low %v3658_v27, %v1773_v0  ;;  %v3694_v46 = vmul.u32.u64.high %v3658_v27, %v1773_v0, %v3693_v8  ;;  %v1844_v40 = vadd.s32 1, %v2657_v56 }
 0x103   :  { %v1487_v60 = vor.u32 %v1486_v3, %v1485_v10  ;;  %v1490_v9 = vshll.u32 %v1489_v54, 23  ;;  %v3698_v42 = vmul.u32.u64.low %v3658_v27, %v1777_v16  ;;  %v3699_v58 = vmul.u32.u64.high %v3658_v27, %v1777_v16, %v3698_v42 }
 0x104   :  { %v2772_v38 = vpop.eup %2771  ;;  %vm1845_vm2 = vcmp.gt.s32.totalorder %v1844_v40, 0  ;;  %v1785_v17 = vmul.u32 %v3658_v27, %v1769_v13  ;;  %v1788_v6 = vadd.s32 1, %v3694_v46  ;;  %v1501_v1 = vsel %vm3677_vm1, 0, %v1499_v35 }
 0x105   :  { %v2774_v59 = vpop.eup %2773  ;;  %v1408_v20 = vxor.u32 2147483648, %v2772_v38  ;;  %v1491_v19 = vor.u32 4788187, %v1490_v9  ;;  %v1494_v24 = vcvt.s32.f32 %v1487_v60  ;;  %v1846_v15 = vsel %vm1845_vm2, %v1844_v40, 0 }
 0x106   :  { %v1405_v28 = vxor.u32 2147483648, %v2774_v59  ;;  %vm1787_vm3 = vc.u32 %v3699_v58, %v3693_v8  ;;  %v1848_v27 = vand.u32 31, %v1846_v15  ;;  %v3733_v12 = vshrl.u32 %v1846_v15, 5 }
 0x107   :  { %v1409_v29 = vsel %vm1407_vm6, %v1408_v20, %v2774_v59  ;;  %v1619_v63 = vsel %vm1617_vm8, %v1408_v20, %v2774_v59  ;;  %v1492_v36 = vand.u32 2147483647, %v1491_v19  ;;  %v1789_v21 = vsel %vm1787_vm3, %v1788_v6, %v3694_v46 }
 0x108   :  { %v1406_v2 = vsel %vm1404_vm4, %v2772_v38, %v1405_v28  ;;  %v1616_v33 = vsel %vm1614_vm9, %v2772_v38, %v1405_v28  ;;  %v1790_v50 = vadd.s32 %v1789_v21, %v1785_v17  ;;  %v1849_v55 = vsub.s32 32, %v1848_v27 }
 0x109   :  { %v1410_v7 = vsel %vm1403_vm13, %v1406_v2, %v1409_v29  ;;  %v1620_v44 = vsel %vm1613_vm15, %v1616_v33, %v1619_v63  ;;  %v1495_v23 = vmul.f32 %v1494_v24, %v1492_v36  ;;  %v1851_v31 = vshll.u32 %v2846_v45, %v1848_v27 }
 0x10a   :  { %v1411_v34 = vsel %vm1400_vm0, nan, %v1410_v7  ;;  %v1621_v25 = vsel %vm1400_vm0, nan, %v1620_v44  ;;  %v1854_v52 = vshll.u32 %v2847_v47, %v1848_v27  ;;  %v1857_v10 = vshll.u32 %v2848_v49, %v1848_v27 }
 0x10b   :  { %1517 = vst [vmem:[#allocation5 + $0x30] sm:$0xff] %v1411_v34  ;;  %1726 = vst [vmem:[#allocation5 + $0x90] sm:$0xff] %v1621_v25  ;;  %v1496_v39 = vxor.u32 2147483648, %v1495_v23  ;;  %v1860_v4 = vshll.u32 %v2849_v51, %v1848_v27  ;;  %v1791_v48 = vadd.s32 536870912, %v1790_v50  ;;  %v1852_v30 = vshrl.u32 %v2847_v47, %v1849_v55 }
 0x10c   :  { %v1855_v5 = vshrl.u32 %v2848_v49, %v1849_v55  ;;  %v1863_v0 = vshll.u32 %v2850_v53, %v1848_v27  ;;  %v1858_v56 = vshrl.u32 %v2849_v51, %v1849_v55  ;;  %v1861_v3 = vshrl.u32 %v2850_v53, %v1849_v55 }
 0x10d   :  { %v1497_v37 = vsel %vm1414_vm7, %v1496_v39, %v1495_v23  ;;  %v1864_v54 = vshrl.u32 %v2851_v61, %v1849_v55  ;;  %v1792_v32 = vshrl.u32 %v1791_v48, 30  ;;  %v1853_v16 = vor.u32 %v1852_v30, %v1851_v31 }
 0x10e   :  { %v1500_v13 = vsel %vm3677_vm1, %v3418_v57, %v1497_v37  ;;  %v1856_v46 = vor.u32 %v1855_v5, %v1854_v52  ;;  %v1505_v40 = vadd.s32 3, %v1501_v1  ;;  %v1842_v38 = vor.u32 8388608, %v3706_v18 }
 0x10f   :  { %2775 = vcosq.f32 %v1500_v13  ;;  %v1862_v60 = vor.u32 %v1861_v3, %v1860_v4  ;;  %v1793_v9 = vshll.u32 %v1792_v32, 30  ;;  %v1859_v42 = vor.u32 %v1858_v56, %v1857_v10 }
 0x110   :  { %2777 = vsinq.f32 %v1500_v13  ;;  %vm1866_vm6 = vcmp.lt.s32.totalorder %v3733_v12, 1  ;;  %v1715_v59 = vand.u32 3, %v1501_v1  ;;  %v1865_v20 = vor.u32 %v1864_v54, %v1863_v0 }
 0x111   :  { %vm1868_vm7 = vcmp.lt.s32.totalorder %v3733_v12, 3  ;;  %vm1869_vm8 = vcmp.lt.s32.totalorder %v3733_v12, 4  ;;  %v3752_v22 = vsub.s32 %v1790_v50, %v1793_v9  ;;  %v1850_v35 = vshrl.u32 %v2846_v45, %v1849_v55 }
 0x112   :  { %vm1867_vm5 = vcmp.lt.s32.totalorder %v3733_v12, 2  ;;  %v1874_v18 = vsel %vm1866_vm6, %v1853_v16, %v1856_v46  ;;  %v1506_v28 = vand.u32 3, %v1505_v40  ;;  %vm1732_vm4 = vcmp.lt.s32.totalorder %v3445_v62, 0 }
 0x113   :  { %v1875_v19 = vsel %vm1869_vm8, %v1862_v60, 920167782  ;;  %v1882_v24 = vshll.u32 %v1842_v38, 8  ;;  %vm1504_vm9 = vweird.f32 %v3418_v57  ;;  %v1796_v15 = vsub.s32 0, %v3752_v22 }
 0x114   :  { %v1871_v29 = vsel %vm1869_vm8, %v1859_v42, 2102212464  ;;  %v1876_v63 = vsel %vm1868_vm7, %v1859_v42, %v1875_v19  ;;  %v1878_v17 = vsel %vm1866_vm6, %v1856_v46, %v1859_v42  ;;  %vm1716_vm10 = vcmp.lt.s32.totalorder %v1715_v59, 2 }
 0x115   :  { %v1877_v6 = vsel %vm1867_vm5, %v1874_v18, %v1876_v63  ;;  %v1879_v2 = vsel %vm1869_vm8, %v1865_v20, 1326507024  ;;  %v3774_v36 = vmul.f32 428.93213, %v2878_v11  ;;  %v2654_v1 = vmin.u32 %v1796_v15, %v3752_v22 }
 0x116   :  { %v1816_v33 = vsub.s32 4, %v1792_v32  ;;  %v1870_v7 = vsel %vm1866_vm6, %v1850_v35, %v1853_v16  ;;  %v1880_v44 = vsel %vm1868_vm7, %v1862_v60, %v1879_v2  ;;  %v1872_v27 = vsel %vm1868_vm7, %v1856_v46, %v1871_v29 }
 0x117   :  { %v1881_v34 = vsel %vm1867_vm5, %v1878_v17, %v1880_v44  ;;  %v3785_v23 = vmul.u32.u64.low %v1882_v24, %v1877_v6  ;;  %v3786_v25 = vmul.u32.u64.high %v1882_v24, %v1877_v6, %v3785_v23  ;;  %vm1507_vm11 = vcmp.lt.s32.totalorder %v1506_v28, 2 }
 0x118   :  { %vm1717_vm12 = vcmp.eq.s32.totalorder %v1715_v59, 0  ;;  %vm1720_vm13 = vcmp.eq.s32.totalorder %v1715_v59, 2  ;;  %vm3791_vm14 = vcmp.le.f32.partialorder %v1730_v41, 0.7853982  ;;  %v1798_v21 = vclz %v2654_v1 }
 0x119   :  { %v2776_v50 = vpop.eup %2775  ;;  %vm1508_vm15 = vcmp.eq.s32.totalorder %v1506_v28, 0  ;;  %vm1511_vm0 = vcmp.eq.s32.totalorder %v1506_v28, 2  ;;  %v3795_v55 = vmul.u32.u64.low %v1882_v24, %v1881_v34  ;;  %v3796_v31 = vmul.u32.u64.high %v1882_v24, %v1881_v34, %v3795_v55 }
 0x11a   :  { %v2778_v52 = vpop.eup %2777  ;;  %v1512_v39 = vxor.u32 2147483648, %v2776_v50  ;;  %v2655_v10 = vadd.s32 4294967294, %v1798_v21  ;;  %v1873_v4 = vsel %vm1867_vm5, %v1870_v7, %v1872_v27  ;;  %v2155_v48 = vand.u32 2139095040, %v3774_v36 }
 0x11b   :  { %v1509_v30 = vxor.u32 2147483648, %v2778_v52  ;;  %v1786_v41 = vadd.s32 %v3693_v8, %v3699_v58  ;;  %v1817_v5 = vsel %vm1732_vm4, %v1816_v33, %v1792_v32  ;;  %v1892_v0 = vadd.s32 1, %v3786_v25 }
 0x11c   :  { %v1513_v37 = vsel %vm1511_vm0, %v1512_v39, %v2778_v52  ;;  %v1722_v56 = vsel %vm1720_vm13, %v1512_v39, %v2778_v52  ;;  %vm2656_vm1 = vcmp.lt.s32.totalorder %v2655_v10, 0  ;;  %v2156_v3 = vshrl.u32 %v2155_v48, 23 }
 0x11d   :  { %v1510_v54 = vsel %vm1508_vm15, %v2776_v50, %v1509_v30  ;;  %v1719_v12 = vsel %vm1717_vm12, %v2776_v50, %v1509_v30  ;;  %v1801_v13 = vsel %vm2656_vm1, 0, %v2655_v10  ;;  %v1889_v16 = vmul.u32 %v1882_v24, %v1873_v4 }
 0x11e   :  { %v1514_v46 = vsel %vm1507_vm11, %v1510_v54, %v1513_v37  ;;  %v1723_v8 = vsel %vm1716_vm10, %v1719_v12, %v1722_v56  ;;  %v1802_v58 = vsub.s32 32, %v1801_v13  ;;  %v1803_v32 = vshll.u32 %v3752_v22, %v1801_v13 }
 0x11f   :  { %v1515_v40 = vsel %vm1504_vm9, nan, %v1514_v46  ;;  %v1724_v38 = vsel %vm1504_vm9, nan, %v1723_v8  ;;  %v1806_v60 = vsub.s32 4294967266, %v1801_v13  ;;  %vm1891_vm2 = vc.u32 %v3796_v31, %v3785_v23 }
 0x120   :  { %1518 = vst [vmem:[#allocation5 + $0x38] sm:$0xff] %v1515_v40  ;;  %1727 = vst [vmem:[#allocation5 + $0x98] sm:$0xff] %v1724_v38  ;;  %v1804_v9 = vshrl.u32 %v1786_v41, %v1802_v58  ;;  %v1893_v42 = vsel %vm1891_vm2, %v1892_v0, %v3786_v25  ;;  %v2152_v59 = vand.u32 2147483647, %v3774_v36  ;;  %v2669_v20 = vadd.s32 4294967169, %v2156_v3 }
 0x121   :  { %v1807_v35 = vadd.s32 127, %v1806_v60  ;;  %v1819_v22 = vsel %vm3791_vm14, 0, %v1817_v5  ;;  %v1894_v18 = vadd.s32 %v1893_v42, %v1889_v16  ;;  %v3825_v63 = vmul.f32 428.93213, %v2883_v14 }
 0x122   :  { %v1805_v28 = vor.u32 %v1804_v9, %v1803_v32  ;;  %v2162_v57 = vadd.s32 1, %v2669_v20  ;;  %v1823_v15 = vadd.s32 3, %v1819_v22  ;;  %v2159_v29 = vand.u32 8388607, %v2152_v59 }
 0x123   :  { %v1808_v19 = vshll.u32 %v1807_v35, 23  ;;  %v1895_v24 = vadd.s32 536870912, %v1894_v18  ;;  %v3832_v34 = vand.u32 3, %v1819_v22  ;;  %v2259_v14 = vand.u32 2139095040, %v3825_v63 }
 0x124   :  { %vm2163_vm3 = vcmp.gt.s32.totalorder %v2162_v57, 0  ;;  %v1812_v6 = vcvt.s32.f32 %v1805_v28  ;;  %v3830_v27 = vand.u32 3, %v1823_v15  ;;  %v2160_v55 = vor.u32 8388608, %v2159_v29 }
 0x125   :  { %v1809_v17 = vor.u32 4788187, %v1808_v19  ;;  %v3827_v2 = vshrl.u32 %v1895_v24, 30  ;;  %v2164_v1 = vsel %vm2163_vm3, %v2162_v57, 0  ;;  %v1890_v30 = vadd.s32 %v3785_v23, %v3796_v31 }
 0x126   :  { %v2166_v33 = vand.u32 31, %v2164_v1  ;;  %v2256_v5 = vand.u32 2147483647, %v3825_v63  ;;  %v2165_v13 = vshrl.u32 %v2164_v1, 5  ;;  %v2260_v16 = vshrl.u32 %v2259_v14, 23 }
 0x127   :  { %v1810_v7 = vand.u32 2147483647, %v1809_v17  ;;  %v1897_v44 = vshll.u32 %v3827_v2, 30  ;;  %v3855_v8 = vshll.u32 %v2160_v55, 8  ;;  %vm1829_vm6 = vcmp.eq.s32.totalorder %v3830_v27, 2 }
 0x128   :  { %v2167_v25 = vsub.s32 32, %v2166_v33  ;;  %v2169_v52 = vshll.u32 %v2846_v45, %v2166_v33  ;;  %v2172_v10 = vshll.u32 %v2847_v47, %v2166_v33  ;;  %v2175_v0 = vshll.u32 %v2848_v49, %v2166_v33 }
 0x129   :  { %v1813_v21 = vmul.f32 %v1812_v6, %v1810_v7  ;;  %v3834_v50 = vsub.s32 %v1894_v18, %v1897_v44  ;;  %v2178_v56 = vshll.u32 %v2849_v51, %v2166_v33  ;;  %v3860_v40 = vand.u32 8388607, %v2256_v5 }
 0x12a   :  { %v2170_v39 = vshrl.u32 %v2847_v47, %v2167_v25  ;;  %v2173_v4 = vshrl.u32 %v2848_v49, %v2167_v25  ;;  %v2176_v37 = vshrl.u32 %v2849_v51, %v2167_v25  ;;  %v2179_v3 = vshrl.u32 %v2850_v53, %v2167_v25 }
 0x12b   :  { %v1814_v48 = vxor.u32 2147483648, %v1813_v21  ;;  %v1900_v41 = vsub.s32 0, %v3834_v50  ;;  %v2168_v32 = vshrl.u32 %v2846_v45, %v2167_v25  ;;  %v2181_v9 = vshll.u32 %v2850_v53, %v2166_v33 }
 0x12c   :  { %v2171_v31 = vor.u32 %v2170_v39, %v2169_v52  ;;  %v2174_v46 = vor.u32 %v2173_v4, %v2172_v10  ;;  %v2177_v38 = vor.u32 %v2176_v37, %v2175_v0  ;;  %v2180_v60 = vor.u32 %v2179_v3, %v2178_v56 }
 0x12d   :  { %v1815_v54 = vsel %vm1732_vm4, %v1814_v48, %v1813_v21  ;;  %v2658_v12 = vmin.u32 %v1900_v41, %v3834_v50  ;;  %vm1836_vm7 = vcmp.lt.s32.totalorder %v3636_v26, 0  ;;  %vm2039_vm8 = vcmp.eq.s32.totalorder %v3832_v34, 2 }
 0x12e   :  { %v1818_v23 = vsel %vm3791_vm14, %v3445_v62, %v1815_v54  ;;  %v2182_v42 = vshrl.u32 %v2851_v61, %v2167_v25  ;;  %vm2184_vm5 = vcmp.lt.s32.totalorder %v2165_v13, 1  ;;  %v2673_v20 = vadd.s32 4294967169, %v2260_v16 }
 0x12f   :  { %2779 = vcosq.f32 %v1818_v23  ;;  %v1902_v58 = vclz %v2658_v12  ;;  %vm1826_vm4 = vcmp.eq.s32.totalorder %v3830_v27, 0  ;;  %vm2036_vm9 = vcmp.eq.s32.totalorder %v3832_v34, 0 }
 0x130   :  { %2781 = vsinq.f32 %v1818_v23  ;;  %vm2185_vm10 = vcmp.lt.s32.totalorder %v2165_v13, 2  ;;  %vm2186_vm11 = vcmp.lt.s32.totalorder %v2165_v13, 3  ;;  %vm2187_vm12 = vcmp.lt.s32.totalorder %v2165_v13, 4 }
 0x131   :  { %v2659_v11 = vadd.s32 4294967294, %v1902_v58  ;;  %v2192_v35 = vsel %vm2184_vm5, %v2171_v31, %v2174_v46  ;;  %vm1825_vm13 = vcmp.lt.s32.totalorder %v3830_v27, 2  ;;  %vm2035_vm15 = vcmp.lt.s32.totalorder %v3832_v34, 2 }
 0x132   :  { %v2183_v22 = vor.u32 %v2182_v42, %v2181_v9  ;;  %v2189_v18 = vsel %vm2187_vm12, %v2177_v38, 2102212464  ;;  %v2193_v28 = vsel %vm2187_vm12, %v2180_v60, 920167782  ;;  %vm1822_vm0 = vweird.f32 %v3445_v62 }
 0x133   :  { %vm2660_vm14 = vcmp.lt.s32.totalorder %v2659_v11, 0  ;;  %vm3877_vm1 = vcmp.le.f32.partialorder %v1834_v43, 0.7853982  ;;  %v2188_v24 = vsel %vm2184_vm5, %v2168_v32, %v2171_v31  ;;  %v2190_v15 = vsel %vm2186_vm11, %v2174_v46, %v2189_v18 }
 0x134   :  { %v1905_v19 = vsel %vm2660_vm14, 0, %v2659_v11  ;;  %v2194_v29 = vsel %vm2186_vm11, %v2177_v38, %v2193_v28  ;;  %v2196_v33 = vsel %vm2184_vm5, %v2174_v46, %v2177_v38  ;;  %v1920_v7 = vsub.s32 4, %v3827_v2 }
 0x135   :  { %v1906_v17 = vsub.s32 32, %v1905_v19  ;;  %v1907_v6 = vshll.u32 %v3834_v50, %v1905_v19  ;;  %v1910_v1 = vsub.s32 4294967266, %v1905_v19  ;;  %v2195_v43 = vsel %vm2185_vm10, %v2192_v35, %v2194_v29 }
 0x136   :  { %v2197_v44 = vsel %vm2187_vm12, %v2183_v22, 1326507024  ;;  %v2266_v25 = vadd.s32 1, %v2673_v20  ;;  %v2191_v14 = vsel %vm2185_vm10, %v2188_v24, %v2190_v15  ;;  %v1921_v3 = vsel %vm1836_vm7, %v1920_v7, %v3827_v2 }
 0x137   :  { %v1908_v21 = vshrl.u32 %v1890_v30, %v1906_v17  ;;  %v1911_v55 = vadd.s32 127, %v1910_v1  ;;  %v2198_v52 = vsel %vm2186_vm11, %v2180_v60, %v2197_v44  ;;  %v2264_v54 = vor.u32 8388608, %v3860_v40 }
 0x138   :  { %v2199_v39 = vsel %vm2185_vm10, %v2196_v33, %v2198_v52  ;;  %v3893_v50 = vmul.u32.u64.low %v3855_v8, %v2195_v43  ;;  %v3894_v10 = vmul.u32.u64.high %v3855_v8, %v2195_v43, %v3893_v50  ;;  %vm2267_vm2 = vcmp.gt.s32.totalorder %v2266_v25, 0 }
 0x139   :  { %v2780_v4 = vpop.eup %2779  ;;  %v1909_v48 = vor.u32 %v1908_v21, %v1907_v6  ;;  %v1912_v41 = vshll.u32 %v1911_v55, 23  ;;  %v3898_v0 = vmul.u32.u64.low %v3855_v8, %v2199_v39  ;;  %v3899_v37 = vmul.u32.u64.high %v3855_v8, %v2199_v39, %v3898_v0 }
 0x13a   :  { %v2782_v30 = vpop.eup %2781  ;;  %v1830_v56 = vxor.u32 2147483648, %v2780_v4  ;;  %v2268_v12 = vsel %vm2267_vm2, %v2266_v25, 0  ;;  %v2207_v31 = vmul.u32 %v3855_v8, %v2191_v14  ;;  %v2210_v32 = vadd.s32 1, %v3894_v10 }
 0x13b   :  { %v1827_v13 = vxor.u32 2147483648, %v2782_v30  ;;  %v1913_v16 = vor.u32 4788187, %v1912_v41  ;;  %v1916_v23 = vcvt.s32.f32 %v1909_v48  ;;  %v2270_v38 = vand.u32 31, %v2268_v12 }
 0x13c   :  { %v1831_v46 = vsel %vm1829_vm6, %v1830_v56, %v2782_v30  ;;  %v2041_v58 = vsel %vm2039_vm8, %v1830_v56, %v2782_v30  ;;  %v1923_v40 = vsel %vm3877_vm1, 0, %v1921_v3  ;;  %vm2209_vm3 = vc.u32 %v3899_v37, %v3893_v50 }
 0x13d   :  { %v1828_v2 = vsel %vm1826_vm4, %v2780_v4, %v1827_v13  ;;  %v1914_v60 = vand.u32 2147483647, %v1913_v16  ;;  %v2038_v9 = vsel %vm2036_vm9, %v2780_v4, %v1827_v13  ;;  %v2271_v42 = vsub.s32 32, %v2270_v38 }
 0x13e   :  { %v1832_v8 = vsel %vm1825_vm13, %v1828_v2, %v1831_v46  ;;  %v2042_v11 = vsel %vm2035_vm15, %v2038_v9, %v2041_v58  ;;  %v2211_v18 = vsel %vm2209_vm3, %v2210_v32, %v3894_v10  ;;  %v2269_v28 = vshrl.u32 %v2268_v12, 5 }
 0x13f   :  { %v1833_v20 = vsel %vm1822_vm0, nan, %v1832_v8  ;;  %v1917_v35 = vmul.f32 %v1916_v23, %v1914_v60  ;;  %v2043_v22 = vsel %vm1822_vm0, nan, %v2042_v11  ;;  %v2212_v27 = vadd.s32 %v2211_v18, %v2207_v31 }
 0x140   :  { %1939 = vst [vmem:[#allocation5 + $0x40] sm:$0xff] %v1833_v20  ;;  %2148 = vst [vmem:[#allocation5 + $0xa0] sm:$0xff] %v2043_v22  ;;  %v2273_v34 = vshll.u32 %v2846_v45, %v2270_v38  ;;  %v2274_v19 = vshrl.u32 %v2847_v47, %v2271_v42  ;;  %v2276_v15 = vshll.u32 %v2847_v47, %v2270_v38  ;;  %v3945_v55 = vshll.u32 %v2264_v54, 8 }
 0x141   :  { %v1918_v24 = vxor.u32 2147483648, %v1917_v35  ;;  %v2277_v29 = vshrl.u32 %v2848_v49, %v2271_v42  ;;  %v2279_v17 = vshll.u32 %v2848_v49, %v2270_v38  ;;  %v2213_v6 = vadd.s32 536870912, %v2212_v27 }
 0x142   :  { %v2275_v62 = vor.u32 %v2274_v19, %v2273_v34  ;;  %v2280_v1 = vshrl.u32 %v2849_v51, %v2271_v42  ;;  %v2282_v33 = vshll.u32 %v2849_v51, %v2270_v38  ;;  %v2283_v44 = vshrl.u32 %v2850_v53, %v2271_v42 }
 0x143   :  { %v1919_v7 = vsel %vm1836_vm7, %v1918_v24, %v1917_v35  ;;  %v2278_v43 = vor.u32 %v2277_v29, %v2276_v15  ;;  %v2285_v25 = vshll.u32 %v2850_v53, %v2270_v38  ;;  %v3942_v21 = vshrl.u32 %v2213_v6, 30 }
 0x144   :  { %v1922_v47 = vsel %vm3877_vm1, %v3636_v26, %v1919_v7  ;;  %v2286_v49 = vshrl.u32 %v2851_v61, %v2271_v42  ;;  %v2281_v51 = vor.u32 %v2280_v1, %v2279_v17  ;;  %v2284_v14 = vor.u32 %v2283_v44, %v2282_v33 }
 0x145   :  { %2783 = vcosq.f32 %v1922_v47  ;;  %vm2288_vm6 = vcmp.lt.s32.totalorder %v2269_v28, 1  ;;  %v1927_v52 = vadd.s32 3, %v1923_v40  ;;  %v2215_v39 = vshll.u32 %v3942_v21, 30 }
 0x146   :  { %2785 = vsinq.f32 %v1922_v47  ;;  %vm2289_vm7 = vcmp.lt.s32.totalorder %v2269_v28, 2  ;;  %v2287_v53 = vor.u32 %v2286_v49, %v2285_v25  ;;  %vm2290_vm8 = vcmp.lt.s32.totalorder %v2269_v28, 3 }
 0x147   :  { %vm2291_vm5 = vcmp.lt.s32.totalorder %v2269_v28, 4  ;;  %v2296_v57 = vsel %vm2288_vm6, %v2275_v62, %v2278_v43  ;;  %v2216_v10 = vsub.s32 %v2212_v27, %v2215_v39  ;;  %v2137_v48 = vand.u32 3, %v1923_v40 }
 0x148   :  { %v2297_v4 = vsel %vm2291_vm5, %v2284_v14, 920167782  ;;  %v2272_v61 = vshrl.u32 %v2846_v45, %v2271_v42  ;;  %v2293_v30 = vsel %vm2291_vm5, %v2281_v51, 2102212464  ;;  %v2300_v3 = vsel %vm2288_vm6, %v2278_v43, %v2281_v51 }
 0x149   :  { %v2298_v41 = vsel %vm2290_vm8, %v2281_v51, %v2297_v4  ;;  %v2218_v0 = vsub.s32 0, %v2216_v10  ;;  %v1928_v54 = vand.u32 3, %v1927_v52  ;;  %v2301_v12 = vsel %vm2291_vm5, %v2287_v53, 1326507024 }
 0x14a   :  { %v2299_v56 = vsel %vm2289_vm7, %v2296_v57, %v2298_v41  ;;  %v2302_v31 = vsel %vm2290_vm8, %v2284_v14, %v2301_v12  ;;  %v2292_v45 = vsel %vm2288_vm6, %v2272_v61, %v2275_v62  ;;  %v2294_v46 = vsel %vm2290_vm8, %v2278_v43, %v2293_v30 }
 0x14b   :  { %v3954_v13 = vmul.u32.u64.low %v3945_v55, %v2299_v56  ;;  %v3955_v16 = vmul.u32.u64.high %v3945_v55, %v2299_v56, %v3954_v13  ;;  %v2670_v23 = vmin.u32 %v2218_v0, %v2216_v10  ;;  %v2303_v58 = vsel %vm2289_vm7, %v2300_v3, %v2302_v31 }
 0x14c   :  { %vm1926_vm4 = vweird.f32 %v3636_v26  ;;  %vm2139_vm9 = vcmp.eq.s32.totalorder %v2137_v48, 0  ;;  %vm1933_vm10 = vcmp.eq.s32.totalorder %v1928_v54, 2  ;;  %vm2142_vm11 = vcmp.eq.s32.totalorder %v2137_v48, 2 }
 0x14d   :  { %v2220_v32 = vclz %v2670_v23  ;;  %v3964_v2 = vmul.u32.u64.low %v3945_v55, %v2303_v58  ;;  %v3965_v60 = vmul.u32.u64.high %v3945_v55, %v2303_v58, %v3964_v2  ;;  %vm1930_vm12 = vcmp.eq.s32.totalorder %v1928_v54, 0 }
 0x14e   :  { %v2295_v11 = vsel %vm2289_vm7, %v2292_v45, %v2294_v46  ;;  %vm1929_vm13 = vcmp.lt.s32.totalorder %v1928_v54, 2  ;;  %vm2138_vm14 = vcmp.lt.s32.totalorder %v2137_v48, 2  ;;  %v2208_v20 = vadd.s32 %v3893_v50, %v3899_v37 }
 0x14f   :  { %v2784_v38 = vpop.eup %2783  ;;  %v2671_v8 = vadd.s32 4294967294, %v2220_v32  ;;  %v2314_v18 = vadd.s32 1, %v3955_v16  ;;  %v2311_v24 = vmul.u32 %v3945_v55, %v2295_v11  ;;  %vm2313_vm0 = vc.u32 %v3965_v60, %v3954_v13 }
 0x150   :  { %v2786_v40 = vpop.eup %2785  ;;  %v1934_v9 = vxor.u32 2147483648, %v2784_v38  ;;  %v2238_v26 = vsub.s32 4, %v3942_v21  ;;  %vm2154_vm1 = vcmp.lt.s32.totalorder %v3774_v36, 0  ;;  %vm2153_vm2 = vcmp.le.f32.partialorder %v2152_v59, 0.7853982 }
 0x151   :  { %v1931_v42 = vxor.u32 2147483648, %v2786_v40  ;;  %vm2672_vm15 = vcmp.lt.s32.totalorder %v2671_v8, 0  ;;  %v2315_v1 = vsel %vm2313_vm0, %v2314_v18, %v3955_v16  ;;  %v2312_v3 = vadd.s32 %v3954_v13, %v3965_v60 }
 0x152   :  { %v1935_v35 = vsel %vm1933_vm10, %v1934_v9, %v2786_v40  ;;  %v2144_v22 = vsel %vm2142_vm11, %v1934_v9, %v2786_v40  ;;  %v2223_v19 = vsel %vm2672_vm15, 0, %v2671_v8  ;;  %v2316_v7 = vadd.s32 %v2315_v1, %v2311_v24 }
 0x153   :  { %v1932_v27 = vsel %vm1930_vm12, %v2784_v38, %v1931_v42  ;;  %v2141_v34 = vsel %vm2139_vm9, %v2784_v38, %v1931_v42  ;;  %v2224_v29 = vsub.s32 32, %v2223_v19  ;;  %v2225_v17 = vshll.u32 %v2216_v10, %v2223_v19 }
 0x154   :  { %v1936_v15 = vsel %vm1929_vm13, %v1932_v27, %v1935_v35  ;;  %v2145_v28 = vsel %vm2138_vm14, %v2141_v34, %v2144_v22  ;;  %v2228_v37 = vsub.s32 4294967266, %v2223_v19  ;;  %v2317_v25 = vadd.s32 536870912, %v2316_v7 }
 0x155   :  { %v1937_v6 = vsel %vm1926_vm4, nan, %v1936_v15  ;;  %v2146_v50 = vsel %vm1926_vm4, nan, %v2145_v28  ;;  %v2226_v62 = vshrl.u32 %v2208_v20, %v2224_v29  ;;  %v2239_v53 = vsel %vm2154_vm1, %v2238_v26, %v3942_v21 }
 0x156   :  { %1940 = vst [vmem:[#allocation5 + $0x48] sm:$0xff] %v1937_v6  ;;  %2149 = vst [vmem:[#allocation5 + $0xa8] sm:$0xff] %v2146_v50  ;;  %v2229_v33 = vadd.s32 127, %v2228_v37  ;;  %v2318_v55 = vshrl.u32 %v2317_v25, 30  ;;  %v2241_v48 = vsel %vm2153_vm2, 0, %v2239_v53  ;;  %vm2244_vm10 = vweird.f32 %v3774_v36 }
 0x157   :  { %v2227_v43 = vor.u32 %v2226_v62, %v2225_v17  ;;  %v2245_v30 = vadd.s32 3, %v2241_v48  ;;  %v2456_v23 = vand.u32 3, %v2241_v48  ;;  %vm2258_vm11 = vcmp.lt.s32.totalorder %v3825_v63, 0 }
 0x158   :  { %v2230_v44 = vshll.u32 %v2229_v33, 23  ;;  %v2319_v14 = vshll.u32 %v2318_v55, 30  ;;  %v2342_v20 = vsub.s32 4, %v2318_v55  ;;  %vm2257_vm12 = vcmp.le.f32.partialorder %v2256_v5, 0.7853982 }
 0x159   :  { %v2234_v49 = vcvt.s32.f32 %v2227_v43  ;;  %v2246_v21 = vand.u32 3, %v2245_v30  ;;  %vm2461_vm7 = vcmp.eq.s32.totalorder %v2456_v23, 2  ;;  %vm2458_vm4 = vcmp.eq.s32.totalorder %v2456_v23, 0 }
 0x15a   :  { %v2231_v47 = vor.u32 4788187, %v2230_v44  ;;  %v2320_v39 = vsub.s32 %v2316_v7, %v2319_v14  ;;  %vm2457_vm9 = vcmp.lt.s32.totalorder %v2456_v23, 2 }
 0x15b   :  { %vm2251_vm6 = vcmp.eq.s32.totalorder %v2246_v21, 2  ;;  %vm2247_vm8 = vcmp.lt.s32.totalorder %v2246_v21, 2  ;;  %vm2248_vm5 = vcmp.eq.s32.totalorder %v2246_v21, 0 }
 0x15c   :  { %v2232_v51 = vand.u32 2147483647, %v2231_v47  ;;  %v2322_v10 = vsub.s32 0, %v2320_v39 }
 0x15e   :  { %v2235_v52 = vmul.f32 %v2234_v49, %v2232_v51  ;;  %v2674_v61 = vmin.u32 %v2322_v10, %v2320_v39 }
 0x160   :  { %v2236_v57 = vxor.u32 2147483648, %v2235_v52  ;;  %v2324_v0 = vclz %v2674_v61 }
 0x162   :  { %v2237_v4 = vsel %vm2154_vm1, %v2236_v57, %v2235_v52  ;;  %v2675_v56 = vadd.s32 4294967294, %v2324_v0 }
 0x163   :  { %v2240_v41 = vsel %vm2153_vm2, %v3774_v36, %v2237_v4  ;;  %v2343_v36 = vsel %vm2258_vm11, %v2342_v20, %v2318_v55 }
 0x164   :  { %2787 = vcosq.f32 %v2240_v41  ;;  %vm2676_vm3 = vcmp.lt.s32.totalorder %v2675_v56, 0  ;;  %v2345_v29 = vsel %vm2257_vm12, 0, %v2343_v36 }
 0x165   :  { %2789 = vsinq.f32 %v2240_v41  ;;  %v2327_v54 = vsel %vm2676_vm3, 0, %v2675_v56  ;;  %v2349_v17 = vadd.s32 3, %v2345_v29  ;;  %v2559_v50 = vand.u32 3, %v2345_v29 }
 0x166   :  { %v2328_v12 = vsub.s32 32, %v2327_v54  ;;  %v2329_v59 = vshll.u32 %v2320_v39, %v2327_v54  ;;  %v2332_v16 = vsub.s32 4294967266, %v2327_v54  ;;  %vm2348_vm3 = vweird.f32 %v3825_v63 }
 0x167   :  { %v2350_v6 = vand.u32 3, %v2349_v17  ;;  %vm2564_vm14 = vcmp.eq.s32.totalorder %v2559_v50, 2  ;;  %vm2561_vm0 = vcmp.eq.s32.totalorder %v2559_v50, 0  ;;  %vm2560_vm2 = vcmp.lt.s32.totalorder %v2559_v50, 2 }
 0x168   :  { %v2330_v31 = vshrl.u32 %v2312_v3, %v2328_v12  ;;  %v2333_v45 = vadd.s32 127, %v2332_v16 }
 0x169   :  { %vm2355_vm13 = vcmp.eq.s32.totalorder %v2350_v6, 2  ;;  %vm2352_vm15 = vcmp.eq.s32.totalorder %v2350_v6, 0  ;;  %vm2351_vm1 = vcmp.lt.s32.totalorder %v2350_v6, 2 }
 0x16a   :  { %v2331_v58 = vor.u32 %v2330_v31, %v2329_v59  ;;  %v2334_v32 = vshll.u32 %v2333_v45, 23 }
 0x16c   :  { %v2335_v60 = vor.u32 4788187, %v2334_v32  ;;  %v2338_v40 = vcvt.s32.f32 %v2331_v58 }
 0x16e   :  { %v2788_v46 = vpop.eup %2787  ;;  %v2336_v42 = vand.u32 2147483647, %v2335_v60 }
 0x16f   :  { %v2790_v38 = vpop.eup %2789  ;;  %v2252_v2 = vxor.u32 2147483648, %v2788_v46 }
 0x170   :  { %v2249_v13 = vxor.u32 2147483648, %v2790_v38  ;;  %v2339_v34 = vmul.f32 %v2338_v40, %v2336_v42 }
 0x171   :  { %v2253_v9 = vsel %vm2251_vm6, %v2252_v2, %v2790_v38  ;;  %v2463_v8 = vsel %vm2461_vm7, %v2252_v2, %v2790_v38 }
 0x172   :  { %v2250_v11 = vsel %vm2248_vm5, %v2788_v46, %v2249_v13  ;;  %v2460_v35 = vsel %vm2458_vm4, %v2788_v46, %v2249_v13  ;;  %v2340_v24 = vxor.u32 2147483648, %v2339_v34 }
 0x173   :  { %v2254_v22 = vsel %vm2247_vm8, %v2250_v11, %v2253_v9  ;;  %v2464_v18 = vsel %vm2457_vm9, %v2460_v35, %v2463_v8 }
 0x174   :  { %v2255_v27 = vsel %vm2244_vm10, nan, %v2254_v22  ;;  %v2465_v19 = vsel %vm2244_vm10, nan, %v2464_v18  ;;  %v2341_v15 = vsel %vm2258_vm11, %v2340_v24, %v2339_v34 }
 0x175   :  { %2361 = vst [vmem:[#allocation5 + $0x50] sm:$0xff] %v2255_v27  ;;  %2570 = vst [vmem:[#allocation5 + $0xb0] sm:$0xff] %v2465_v19  ;;  %v2344_v28 = vsel %vm2257_vm12, %v3825_v63, %v2341_v15 }
 0x176   :  { %2791 = vcosq.f32 %v2344_v28 }
 0x177   :  { %2793 = vsinq.f32 %v2344_v28 }
 0x180   :  { %v2792_v37 = vpop.eup %2791 }
 0x181   :  { %v2794_v62 = vpop.eup %2793  ;;  %v2356_v1 = vxor.u32 2147483648, %v2792_v37 }
 0x182   :  { %v2353_v5 = vxor.u32 2147483648, %v2794_v62 }
 0x183   :  { %v2357_v33 = vsel %vm2355_vm13, %v2356_v1, %v2794_v62  ;;  %v2566_v7 = vsel %vm2564_vm14, %v2356_v1, %v2794_v62 }
 0x184   :  { %v2354_v43 = vsel %vm2352_vm15, %v2792_v37, %v2353_v5  ;;  %v2563_v44 = vsel %vm2561_vm0, %v2792_v37, %v2353_v5 }
 0x185   :  { %v2358_v25 = vsel %vm2351_vm1, %v2354_v43, %v2357_v33  ;;  %v2567_v47 = vsel %vm2560_vm2, %v2563_v44, %v2566_v7 }
 0x186   :  { %v2359_v49 = vsel %vm2348_vm3, nan, %v2358_v25  ;;  %v2568_v55 = vsel %vm2348_vm3, nan, %v2567_v47 }
 0x187   :  { %2362 = vst [vmem:[#allocation5 + $0x58] sm:$0xff] %v2359_v49  ;;  %2571 = vst [vmem:[#allocation5 + $0xb8] sm:$0xff] %v2568_v55 }
 0x188   :  { %2828 = shalt.err (!%p2825_p12)
}
 0x189   :  { %s2829_s24 = scalar_lea.hbm %s4010_s1, 3072 }
 0x18a   :  { %p2830_p13 = scmp.ne.s32.totalorder %s4010_s1, %s2829_s24  ;;  %p2833_p0 = scmp.lt.u32.totalorder %s2829_s24, %s4010_s1 }
 0x18c   :  { %p2835_p1 = pnand %p2833_p0, %p2830_p13 }
 0x18e   :  { %2838 = shalt.err (!%p2835_p1)
}
 0x18f   :  { %2583 = dma.vmem_to_hbm [thread:$0]  %s2578_s20, 3072, %s4010_s1, [#allocation4], %s2844_s16, %s2844_s16, %s2845_s17  }
 0x190   :  { %2841 = dma.done.wait [#allocation4], 3072  }
 0x191   :  { %2842 = vsyncadd [#allocation4], 4294964224 }
 0x192   :  { %2587 = vsyncpa [#allocation3], 1 }
 0x193   :  { %2588 = vsyncpa [#allocation4], 1 }

</bundles_post_ra>
